<compile_context>
chip_gen: v7x
topology: tpu7x:2x2x1
jax: 0.10.0
libtpu: 0.0.40
codegen_flags: <defaults>
</compile_context>

<pallas_src>
import jax
import jax.numpy as jnp
from jax import lax
from jax.experimental import pallas as pl
from jax.experimental.pallas import tpu as pltpu

# ----------------------------- config --------------------------------------
VOCAB = 100
MAX_POS = 16
NUM_LAYERS = 2
NUM_HEADS = 2
HIDDEN = 32
HEAD_DIM = HIDDEN // NUM_HEADS
INTERMEDIATE = 64
LN_EPS = 1e-12

# Order of the stacked weight tensors passed to the fused kernel.
WEIGHT_ORDER = [
    "emb_ln_g", "emb_ln_b",
    "w_q", "b_q", "w_k", "b_k", "w_v", "b_v", "w_o", "b_o",
    "ln1_g", "ln1_b", "w_ffn1", "b_ffn1", "w_ffn2", "b_ffn2",
    "ln2_g", "ln2_b",
]


# --------------------------- kernel helpers ---------------------------------
def _layernorm(x, g, b):
    # var = E[x^2] - E[x]^2: the two cross-lane reductions are independent and
    # can issue back-to-back on the XLU (better ILP than the two-pass form).
    mean = jnp.mean(x, axis=-1, keepdims=True)
    msq = jnp.mean(x * x, axis=-1, keepdims=True)
    var = msq - mean * mean
    return (x - mean) * lax.rsqrt(var + LN_EPS) * g + b


# ----------------------------- fused kernel ---------------------------------
def encoder_fused_kernel(seq_ref,                      # SMEM (B,) int32 lengths
                         x_ref,                        # (1, S, H) embeddings
                         emb_g_ref, emb_b_ref,         # (1, H)
                         wq_ref, bq_ref,               # (L, NH, H, HD), (L, NH, 1, HD)
                         wk_ref, bk_ref,
                         wv_ref, bv_ref,
                         wo_ref, bo_ref,               # (L, NH, HD, H), (L, 1, H)
                         ln1g_ref, ln1b_ref,           # (L, 1, H)
                         w1_ref, b1_ref,               # (L, H, I),  (L, 1, I)
                         w2_ref, b2_ref,               # (L, I, H),  (L, 1, H)
                         ln2g_ref, ln2b_ref,           # (L, 1, H)
                         o_ref):                       # (1, S-2, H)
    b = pl.program_id(0)
    S = x_ref.shape[1]
    n_layers = wq_ref.shape[0]
    n_heads = wq_ref.shape[1]
    length = seq_ref[b]                                # scalar int32 from SMEM

    # Embedding LayerNorm for this example.
    x = _layernorm(x_ref[0], emb_g_ref[...], emb_b_ref[...])        # (S, H)

    # Additive key mask, built once: 0 for valid keys, -1e9 for padding.
    # (Key-side only, matching HF BERT's extended attention mask semantics.)
    col = lax.broadcasted_iota(jnp.int32, (S, S), 1)
    neg = jnp.where(col < length, 0.0, -1e9).astype(jnp.float32)

    for l in range(n_layers):                          # L = 2, unrolled
        attn = None
        for h in range(n_heads):                       # NH = 2, unrolled
            # Head-major weights -> pure 2-D matmuls, no lane slicing.
            # (1/sqrt(HEAD_DIM) is already folded into w_q / b_q.)
            q = jnp.dot(x, wq_ref[l, h],
                        preferred_element_type=jnp.float32) + bq_ref[l, h]
            k = jnp.dot(x, wk_ref[l, h],
                        preferred_element_type=jnp.float32) + bk_ref[l, h]
            v = jnp.dot(x, wv_ref[l, h],
                        preferred_element_type=jnp.float32) + bv_ref[l, h]
            # scores = q @ k^T  (contraction dims avoid an explicit transpose)
            s = lax.dot_general(q, k, (((1,), (1,)), ((), ())),
                                preferred_element_type=jnp.float32) + neg
            m = jnp.max(s, axis=-1, keepdims=True)
            e = jnp.exp(s - m)
            p = e * pl.reciprocal(jnp.sum(e, axis=-1, keepdims=True),
                                  approx=True)
            ctx = jnp.dot(p, v, preferred_element_type=jnp.float32)  # (S, HD)
            # Per-head output projection accumulate -> no head concatenate.
            part = jnp.dot(ctx, wo_ref[l, h],
                           preferred_element_type=jnp.float32)       # (S, H)
            attn = part if attn is None else attn + part
        attn = attn + bo_ref[l]

        h1 = _layernorm(x + attn, ln1g_ref[l], ln1b_ref[l])
        ff = jnp.dot(h1, w1_ref[l],
                     preferred_element_type=jnp.float32) + b1_ref[l]
        # tanh-approx GELU; HF BERT uses erf-GELU but weights here are synthetic.
        ff = jax.nn.gelu(ff)
        ff = jnp.dot(ff, w2_ref[l],
                     preferred_element_type=jnp.float32) + b2_ref[l]
        x = _layernorm(h1 + ff, ln2g_ref[l], ln2b_ref[l])

    # CLS/SEP removal + left shift of padded embeddings (the torch for-loop):
    # output row j reads source row (j+1) if j < length-2 else (j+2).
    a = x[1:S - 1]                                     # rows 1 .. S-2
    c = x[2:S]                                         # rows 2 .. S-1
    row = lax.broadcasted_iota(jnp.int32, (S - 2, 1), 0)
    o_ref[0] = jnp.where(row < length - 2, a, c)       # single slab store


# ----------------------------- params ---------------------------------------
def init_params(key):
    def normal(k, shape):
        return (0.02 * jax.random.normal(k, shape)).astype(jnp.float32)

    def head_major_in(w):      # (H, H) -> (NH, H, HD); output cols head-major
        return jnp.transpose(w.reshape(HIDDEN, NUM_HEADS, HEAD_DIM), (1, 0, 2))

    keys = jax.random.split(key, 3 + NUM_LAYERS)
    params = {
        "word_emb": normal(keys[0], (VOCAB, HIDDEN)),
        "pos_emb": normal(keys[1], (MAX_POS, HIDDEN)),
        "type_emb": normal(keys[2], (2, HIDDEN)),
        "emb_ln_g": jnp.ones((1, HIDDEN), jnp.float32),
        "emb_ln_b": jnp.zeros((1, HIDDEN), jnp.float32),
    }

    scale = 1.0 / (HEAD_DIM ** 0.5)
    layer_names = [n for n in WEIGHT_ORDER if n not in ("emb_ln_g", "emb_ln_b")]
    acc = {n: [] for n in layer_names}
    for li in range(NUM_LAYERS):
        lk = jax.random.split(keys[3 + li], 6)
        # Head-major Q/K/V; attention scale folded into the Q weight (the Q
        # bias would need the same scale -- it is zero here).
        acc["w_q"].append(head_major_in(normal(lk[0], (HIDDEN, HIDDEN))) * scale)
        acc["w_k"].append(head_major_in(normal(lk[1], (HIDDEN, HIDDEN))))
        acc["w_v"].append(head_major_in(normal(lk[2], (HIDDEN, HIDDEN))))
        for n in ("b_q", "b_k", "b_v"):
            acc[n].append(jnp.zeros((NUM_HEADS, 1, HEAD_DIM), jnp.float32))
        # Output projection split head-major along its input dim: (NH, HD, H).
        acc["w_o"].append(
            normal(lk[3], (HIDDEN, HIDDEN)).reshape(NUM_HEADS, HEAD_DIM, HIDDEN))
        acc["b_o"].append(jnp.zeros((1, HIDDEN), jnp.float32))
        acc["ln1_g"].append(jnp.ones((1, HIDDEN), jnp.float32))
        acc["ln1_b"].append(jnp.zeros((1, HIDDEN), jnp.float32))
        acc["w_ffn1"].append(normal(lk[4], (HIDDEN, INTERMEDIATE)))
        acc["b_ffn1"].append(jnp.zeros((1, INTERMEDIATE), jnp.float32))
        acc["w_ffn2"].append(normal(lk[5], (INTERMEDIATE, HIDDEN)))
        acc["b_ffn2"].append(jnp.zeros((1, HIDDEN), jnp.float32))
        acc["ln2_g"].append(jnp.ones((1, HIDDEN), jnp.float32))
        acc["ln2_b"].append(jnp.zeros((1, HIDDEN), jnp.float32))
    for name, tensors in acc.items():
        params[name] = jnp.stack(tensors, axis=0)
    return params


# ----------------------------- forward ---------------------------------------
def encoder_forward(params, features, masks, drop_out_rate=0.1, is_training=False):
    """Mirrors Encoder.forward(features, masks) -> (B, S-2, H).

    nn.Dropout is declared in the torch __init__ but never applied in its
    forward, so it is intentionally a no-op here as well.
    """
    del drop_out_rate, is_training
    B, S = features.shape

    # Embedding lookups (glue in plain JAX): word + position + token_type(0).
    x = (params["word_emb"][features]
         + params["pos_emb"][:S][None, :, :]
         + params["type_emb"][0][None, None, :]).astype(jnp.float32)   # (B,S,H)

    seq_len = jnp.sum(masks.astype(jnp.int32), axis=1)                 # (B,)
    weights = [params[n] for n in WEIGHT_ORDER]

    def replicated(w):
        # Whole (tiny) weight tensor resident in VMEM; constant index_map so
        # it is not re-fetched across grid steps.
        return pl.BlockSpec(w.shape, lambda b, seq, nd=w.ndim: (0,) * nd)

    grid_spec = pltpu.PrefetchScalarGridSpec(
        num_scalar_prefetch=1,                     # seq_len -> SMEM
        grid=(B,),                                 # one example per grid step
        in_specs=[pl.BlockSpec((1, S, HIDDEN), lambda b, seq: (b, 0, 0))]
                 + [replicated(w) for w in weights],
        out_specs=pl.BlockSpec((1, S - 2, HIDDEN), lambda b, seq: (b, 0, 0)),
    )

    return pl.pallas_call(
        encoder_fused_kernel,
        out_shape=jax.ShapeDtypeStruct((B, S - 2, HIDDEN), jnp.float32),
        grid_spec=grid_spec,
        compiler_params=pltpu.CompilerParams(
            dimension_semantics=("parallel",)),    # both TCs on v7x
    )(seq_len, x, *weights)


# ------------------------------- main ----------------------------------------
if __name__ == "__main__":
    B, S = 2, 8
    key = jax.random.PRNGKey(0)
    k_params, k_feat = jax.random.split(key)

    params = init_params(k_params)
    features = jax.random.randint(k_feat, (B, S), 0, VOCAB, dtype=jnp.int32)
    lengths = jnp.array([S, 5], dtype=jnp.int32)            # per-example seq_len
    masks = (jnp.arange(S)[None, :] < lengths[:, None]).astype(jnp.int32)

    out = encoder_forward(params, features, masks)
    out = jax.block_until_ready(out)
    assert out.shape == (B, S - 2, HIDDEN) and out.dtype == jnp.float32
    print("KERNEL_OK")
</pallas_src>

<mosaic_0001>
module attributes {stable_mosaic.version = 11 : i64} {
  func.func @encoder_fused_kernel(%arg0: i32, %arg1: memref<2xi32, #tpu.memory_space<smem>>, %arg2: memref<1x8x32xf32, #tpu.memory_space<vmem>>, %arg3: memref<1x32xf32, #tpu.memory_space<vmem>>, %arg4: memref<1x32xf32, #tpu.memory_space<vmem>>, %arg5: memref<2x2x32x16xf32, #tpu.memory_space<vmem>>, %arg6: memref<2x2x1x16xf32, #tpu.memory_space<vmem>>, %arg7: memref<2x2x32x16xf32, #tpu.memory_space<vmem>>, %arg8: memref<2x2x1x16xf32, #tpu.memory_space<vmem>>, %arg9: memref<2x2x32x16xf32, #tpu.memory_space<vmem>>, %arg10: memref<2x2x1x16xf32, #tpu.memory_space<vmem>>, %arg11: memref<2x2x16x32xf32, #tpu.memory_space<vmem>>, %arg12: memref<2x1x32xf32, #tpu.memory_space<vmem>>, %arg13: memref<2x1x32xf32, #tpu.memory_space<vmem>>, %arg14: memref<2x1x32xf32, #tpu.memory_space<vmem>>, %arg15: memref<2x32x64xf32, #tpu.memory_space<vmem>>, %arg16: memref<2x1x64xf32, #tpu.memory_space<vmem>>, %arg17: memref<2x64x32xf32, #tpu.memory_space<vmem>>, %arg18: memref<2x1x32xf32, #tpu.memory_space<vmem>>, %arg19: memref<2x1x32xf32, #tpu.memory_space<vmem>>, %arg20: memref<2x1x32xf32, #tpu.memory_space<vmem>>, %arg21: memref<1x6x32xf32, #tpu.memory_space<vmem>>) attributes {dimension_semantics = [#tpu.dimension_semantics<parallel>], iteration_bounds = array<i64: 2>, scalar_prefetch = 1 : i64, scratch_operands = 0 : i64, tpu.core_type = #tpu.core_type<tc>, window_params = [{transform_indices = @transform_0, window_bounds = array<i64: 1, 8, 32>}, {pipeline_mode = #tpu.pipeline_mode<synchronous>, transform_indices = @transform_1, window_bounds = array<i64: 1, 32>}, {pipeline_mode = #tpu.pipeline_mode<synchronous>, transform_indices = @transform_2, window_bounds = array<i64: 1, 32>}, {pipeline_mode = #tpu.pipeline_mode<synchronous>, transform_indices = @transform_3, window_bounds = array<i64: 2, 2, 32, 16>}, {pipeline_mode = #tpu.pipeline_mode<synchronous>, transform_indices = @transform_4, window_bounds = array<i64: 2, 2, 1, 16>}, {pipeline_mode = #tpu.pipeline_mode<synchronous>, transform_indices = @transform_5, window_bounds = array<i64: 2, 2, 32, 16>}, {pipeline_mode = #tpu.pipeline_mode<synchronous>, transform_indices = @transform_6, window_bounds = array<i64: 2, 2, 1, 16>}, {pipeline_mode = #tpu.pipeline_mode<synchronous>, transform_indices = @transform_7, window_bounds = array<i64: 2, 2, 32, 16>}, {pipeline_mode = #tpu.pipeline_mode<synchronous>, transform_indices = @transform_8, window_bounds = array<i64: 2, 2, 1, 16>}, {pipeline_mode = #tpu.pipeline_mode<synchronous>, transform_indices = @transform_9, window_bounds = array<i64: 2, 2, 16, 32>}, {pipeline_mode = #tpu.pipeline_mode<synchronous>, transform_indices = @transform_10, window_bounds = array<i64: 2, 1, 32>}, {pipeline_mode = #tpu.pipeline_mode<synchronous>, transform_indices = @transform_11, window_bounds = array<i64: 2, 1, 32>}, {pipeline_mode = #tpu.pipeline_mode<synchronous>, transform_indices = @transform_12, window_bounds = array<i64: 2, 1, 32>}, {pipeline_mode = #tpu.pipeline_mode<synchronous>, transform_indices = @transform_13, window_bounds = array<i64: 2, 32, 64>}, {pipeline_mode = #tpu.pipeline_mode<synchronous>, transform_indices = @transform_14, window_bounds = array<i64: 2, 1, 64>}, {pipeline_mode = #tpu.pipeline_mode<synchronous>, transform_indices = @transform_15, window_bounds = array<i64: 2, 64, 32>}, {pipeline_mode = #tpu.pipeline_mode<synchronous>, transform_indices = @transform_16, window_bounds = array<i64: 2, 1, 32>}, {pipeline_mode = #tpu.pipeline_mode<synchronous>, transform_indices = @transform_17, window_bounds = array<i64: 2, 1, 32>}, {pipeline_mode = #tpu.pipeline_mode<synchronous>, transform_indices = @transform_18, window_bounds = array<i64: 2, 1, 32>}, {transform_indices = @transform_19, window_bounds = array<i64: 1, 6, 32>}]} {
    %0 = arith.index_cast %arg0 : i32 to index
    %1 = memref.load %arg1[%0] : memref<2xi32, #tpu.memory_space<smem>>
    %c0 = arith.constant 0 : index
    %c0_0 = arith.constant 0 : index
    %c0_1 = arith.constant 0 : index
    %2 = vector.load %arg2[%c0, %c0_0, %c0_1] : memref<1x8x32xf32, #tpu.memory_space<vmem>>, vector<1x8x32xf32>
    %3 = vector.shape_cast %2 : vector<1x8x32xf32> to vector<8x32xf32>
    %c0_2 = arith.constant 0 : index
    %c0_3 = arith.constant 0 : index
    %4 = vector.load %arg3[%c0_2, %c0_3] : memref<1x32xf32, #tpu.memory_space<vmem>>, vector<1x32xf32>
    %c0_4 = arith.constant 0 : index
    %c0_5 = arith.constant 0 : index
    %5 = vector.load %arg4[%c0_4, %c0_5] : memref<1x32xf32, #tpu.memory_space<vmem>>, vector<1x32xf32>
    %cst = arith.constant dense<0.000000e+00> : vector<8xf32>
    %6 = vector.multi_reduction <add>, %3, %cst [1] : vector<8x32xf32> to vector<8xf32>
    %7 = vector.shape_cast %6 : vector<8xf32> to vector<8x1xf32>
    %cst_6 = arith.constant 3.200000e+01 : f32
    %8 = vector.broadcast %cst_6 : f32 to vector<8x1xf32>
    %9 = arith.divf %7, %8 : vector<8x1xf32>
    %10 = arith.mulf %3, %3 : vector<8x32xf32>
    %cst_7 = arith.constant dense<0.000000e+00> : vector<8xf32>
    %11 = vector.multi_reduction <add>, %10, %cst_7 [1] : vector<8x32xf32> to vector<8xf32>
    %12 = vector.shape_cast %11 : vector<8xf32> to vector<8x1xf32>
    %cst_8 = arith.constant 3.200000e+01 : f32
    %13 = vector.broadcast %cst_8 : f32 to vector<8x1xf32>
    %14 = arith.divf %12, %13 : vector<8x1xf32>
    %15 = arith.mulf %9, %9 : vector<8x1xf32>
    %16 = arith.subf %14, %15 : vector<8x1xf32>
    %17 = vector.broadcast %9 : vector<8x1xf32> to vector<8x32xf32>
    %18 = arith.subf %3, %17 : vector<8x32xf32>
    %cst_9 = arith.constant 9.99999996E-13 : f32
    %19 = vector.broadcast %cst_9 : f32 to vector<8x1xf32>
    %20 = arith.addf %16, %19 : vector<8x1xf32>
    %21 = math.rsqrt %20 : vector<8x1xf32>
    %22 = vector.broadcast %21 : vector<8x1xf32> to vector<8x32xf32>
    %23 = arith.mulf %18, %22 : vector<8x32xf32>
    %24 = vector.broadcast %4 : vector<1x32xf32> to vector<8x32xf32>
    %25 = arith.mulf %23, %24 : vector<8x32xf32>
    %26 = vector.broadcast %5 : vector<1x32xf32> to vector<8x32xf32>
    %27 = arith.addf %25, %26 : vector<8x32xf32>
    %28 = tpu.iota {dimensions = array<i32: 1>} : vector<8x8xi32>
    %29 = vector.broadcast %1 : i32 to vector<8x8xi32>
    %30 = arith.cmpi slt, %28, %29 : vector<8x8xi32>
    %cst_10 = arith.constant 0.000000e+00 : f32
    %cst_11 = arith.constant -1.000000e+09 : f32
    %31 = vector.broadcast %cst_10 : f32 to vector<8x8xf32>
    %32 = vector.broadcast %cst_11 : f32 to vector<8x8xf32>
    %33 = arith.select %30, %31, %32 : vector<8x8xi1>, vector<8x8xf32>
    %c0_12 = arith.constant 0 : index
    %c0_13 = arith.constant 0 : index
    %c0_14 = arith.constant 0 : index
    %c0_15 = arith.constant 0 : index
    %34 = vector.load %arg5[%c0_12, %c0_13, %c0_14, %c0_15] : memref<2x2x32x16xf32, #tpu.memory_space<vmem>>, vector<1x1x32x16xf32>
    %35 = vector.shape_cast %34 : vector<1x1x32x16xf32> to vector<32x16xf32>
    %cst_16 = arith.constant dense<0.000000e+00> : vector<8x16xf32>
    %36 = tpu.matmul %27, %35, %cst_16 {dimension_numbers = #tpu.dot_dimension_numbers<[1], [0], [0], [1], [0, 0, 1, 1], [], []>} : vector<8x32xf32>, vector<32x16xf32>, vector<8x16xf32> -> vector<8x16xf32>
    %c0_17 = arith.constant 0 : index
    %c0_18 = arith.constant 0 : index
    %c0_19 = arith.constant 0 : index
    %c0_20 = arith.constant 0 : index
    %37 = vector.load %arg6[%c0_17, %c0_18, %c0_19, %c0_20] : memref<2x2x1x16xf32, #tpu.memory_space<vmem>>, vector<1x1x1x16xf32>
    %38 = vector.shape_cast %37 : vector<1x1x1x16xf32> to vector<1x16xf32>
    %39 = vector.broadcast %38 : vector<1x16xf32> to vector<8x16xf32>
    %40 = arith.addf %36, %39 : vector<8x16xf32>
    %c0_21 = arith.constant 0 : index
    %c0_22 = arith.constant 0 : index
    %c0_23 = arith.constant 0 : index
    %c0_24 = arith.constant 0 : index
    %41 = vector.load %arg7[%c0_21, %c0_22, %c0_23, %c0_24] : memref<2x2x32x16xf32, #tpu.memory_space<vmem>>, vector<1x1x32x16xf32>
    %42 = vector.shape_cast %41 : vector<1x1x32x16xf32> to vector<32x16xf32>
    %cst_25 = arith.constant dense<0.000000e+00> : vector<8x16xf32>
    %43 = tpu.matmul %27, %42, %cst_25 {dimension_numbers = #tpu.dot_dimension_numbers<[1], [0], [0], [1], [0, 0, 1, 1], [], []>} : vector<8x32xf32>, vector<32x16xf32>, vector<8x16xf32> -> vector<8x16xf32>
    %c0_26 = arith.constant 0 : index
    %c0_27 = arith.constant 0 : index
    %c0_28 = arith.constant 0 : index
    %c0_29 = arith.constant 0 : index
    %44 = vector.load %arg8[%c0_26, %c0_27, %c0_28, %c0_29] : memref<2x2x1x16xf32, #tpu.memory_space<vmem>>, vector<1x1x1x16xf32>
    %45 = vector.shape_cast %44 : vector<1x1x1x16xf32> to vector<1x16xf32>
    %46 = vector.broadcast %45 : vector<1x16xf32> to vector<8x16xf32>
    %47 = arith.addf %43, %46 : vector<8x16xf32>
    %c0_30 = arith.constant 0 : index
    %c0_31 = arith.constant 0 : index
    %c0_32 = arith.constant 0 : index
    %c0_33 = arith.constant 0 : index
    %48 = vector.load %arg9[%c0_30, %c0_31, %c0_32, %c0_33] : memref<2x2x32x16xf32, #tpu.memory_space<vmem>>, vector<1x1x32x16xf32>
    %49 = vector.shape_cast %48 : vector<1x1x32x16xf32> to vector<32x16xf32>
    %cst_34 = arith.constant dense<0.000000e+00> : vector<8x16xf32>
    %50 = tpu.matmul %27, %49, %cst_34 {dimension_numbers = #tpu.dot_dimension_numbers<[1], [0], [0], [1], [0, 0, 1, 1], [], []>} : vector<8x32xf32>, vector<32x16xf32>, vector<8x16xf32> -> vector<8x16xf32>
    %c0_35 = arith.constant 0 : index
    %c0_36 = arith.constant 0 : index
    %c0_37 = arith.constant 0 : index
    %c0_38 = arith.constant 0 : index
    %51 = vector.load %arg10[%c0_35, %c0_36, %c0_37, %c0_38] : memref<2x2x1x16xf32, #tpu.memory_space<vmem>>, vector<1x1x1x16xf32>
    %52 = vector.shape_cast %51 : vector<1x1x1x16xf32> to vector<1x16xf32>
    %53 = vector.broadcast %52 : vector<1x16xf32> to vector<8x16xf32>
    %54 = arith.addf %50, %53 : vector<8x16xf32>
    %cst_39 = arith.constant dense<0.000000e+00> : vector<8x8xf32>
    %55 = tpu.matmul %40, %47, %cst_39 {dimension_numbers = #tpu.dot_dimension_numbers<[1], [1], [0], [0], [0, 0, 1, 0], [], []>} : vector<8x16xf32>, vector<8x16xf32>, vector<8x8xf32> -> vector<8x8xf32>
    %56 = arith.addf %55, %33 : vector<8x8xf32>
    %cst_40 = arith.constant dense<0xFF800000> : vector<8xf32>
    %57 = vector.multi_reduction <maximumf>, %56, %cst_40 [1] : vector<8x8xf32> to vector<8xf32>
    %58 = vector.shape_cast %57 : vector<8xf32> to vector<8x1xf32>
    %59 = vector.broadcast %58 : vector<8x1xf32> to vector<8x8xf32>
    %60 = arith.subf %56, %59 : vector<8x8xf32>
    %61 = math.exp %60 : vector<8x8xf32>
    %cst_41 = arith.constant dense<0.000000e+00> : vector<8xf32>
    %62 = vector.multi_reduction <add>, %61, %cst_41 [1] : vector<8x8xf32> to vector<8xf32>
    %63 = vector.shape_cast %62 : vector<8xf32> to vector<8x1xf32>
    %64 = tpu.reciprocal %63 {approx = true} : vector<8x1xf32> -> vector<8x1xf32>
    %65 = vector.broadcast %64 : vector<8x1xf32> to vector<8x8xf32>
    %66 = arith.mulf %61, %65 : vector<8x8xf32>
    %cst_42 = arith.constant dense<0.000000e+00> : vector<8x16xf32>
    %67 = tpu.matmul %66, %54, %cst_42 {dimension_numbers = #tpu.dot_dimension_numbers<[1], [0], [0], [1], [0, 0, 1, 1], [], []>} : vector<8x8xf32>, vector<8x16xf32>, vector<8x16xf32> -> vector<8x16xf32>
    %c0_43 = arith.constant 0 : index
    %c0_44 = arith.constant 0 : index
    %c0_45 = arith.constant 0 : index
    %c0_46 = arith.constant 0 : index
    %68 = vector.load %arg11[%c0_43, %c0_44, %c0_45, %c0_46] : memref<2x2x16x32xf32, #tpu.memory_space<vmem>>, vector<1x1x16x32xf32>
    %69 = vector.shape_cast %68 : vector<1x1x16x32xf32> to vector<16x32xf32>
    %cst_47 = arith.constant dense<0.000000e+00> : vector<8x32xf32>
    %70 = tpu.matmul %67, %69, %cst_47 {dimension_numbers = #tpu.dot_dimension_numbers<[1], [0], [0], [1], [0, 0, 1, 1], [], []>} : vector<8x16xf32>, vector<16x32xf32>, vector<8x32xf32> -> vector<8x32xf32>
    %c0_48 = arith.constant 0 : index
    %c1 = arith.constant 1 : index
    %c0_49 = arith.constant 0 : index
    %c0_50 = arith.constant 0 : index
    %71 = vector.load %arg5[%c0_48, %c1, %c0_49, %c0_50] : memref<2x2x32x16xf32, #tpu.memory_space<vmem>>, vector<1x1x32x16xf32>
    %72 = vector.shape_cast %71 : vector<1x1x32x16xf32> to vector<32x16xf32>
    %cst_51 = arith.constant dense<0.000000e+00> : vector<8x16xf32>
    %73 = tpu.matmul %27, %72, %cst_51 {dimension_numbers = #tpu.dot_dimension_numbers<[1], [0], [0], [1], [0, 0, 1, 1], [], []>} : vector<8x32xf32>, vector<32x16xf32>, vector<8x16xf32> -> vector<8x16xf32>
    %c0_52 = arith.constant 0 : index
    %c1_53 = arith.constant 1 : index
    %c0_54 = arith.constant 0 : index
    %c0_55 = arith.constant 0 : index
    %74 = vector.load %arg6[%c0_52, %c1_53, %c0_54, %c0_55] : memref<2x2x1x16xf32, #tpu.memory_space<vmem>>, vector<1x1x1x16xf32>
    %75 = vector.shape_cast %74 : vector<1x1x1x16xf32> to vector<1x16xf32>
    %76 = vector.broadcast %75 : vector<1x16xf32> to vector<8x16xf32>
    %77 = arith.addf %73, %76 : vector<8x16xf32>
    %c0_56 = arith.constant 0 : index
    %c1_57 = arith.constant 1 : index
    %c0_58 = arith.constant 0 : index
    %c0_59 = arith.constant 0 : index
    %78 = vector.load %arg7[%c0_56, %c1_57, %c0_58, %c0_59] : memref<2x2x32x16xf32, #tpu.memory_space<vmem>>, vector<1x1x32x16xf32>
    %79 = vector.shape_cast %78 : vector<1x1x32x16xf32> to vector<32x16xf32>
    %cst_60 = arith.constant dense<0.000000e+00> : vector<8x16xf32>
    %80 = tpu.matmul %27, %79, %cst_60 {dimension_numbers = #tpu.dot_dimension_numbers<[1], [0], [0], [1], [0, 0, 1, 1], [], []>} : vector<8x32xf32>, vector<32x16xf32>, vector<8x16xf32> -> vector<8x16xf32>
    %c0_61 = arith.constant 0 : index
    %c1_62 = arith.constant 1 : index
    %c0_63 = arith.constant 0 : index
    %c0_64 = arith.constant 0 : index
    %81 = vector.load %arg8[%c0_61, %c1_62, %c0_63, %c0_64] : memref<2x2x1x16xf32, #tpu.memory_space<vmem>>, vector<1x1x1x16xf32>
    %82 = vector.shape_cast %81 : vector<1x1x1x16xf32> to vector<1x16xf32>
    %83 = vector.broadcast %82 : vector<1x16xf32> to vector<8x16xf32>
    %84 = arith.addf %80, %83 : vector<8x16xf32>
    %c0_65 = arith.constant 0 : index
    %c1_66 = arith.constant 1 : index
    %c0_67 = arith.constant 0 : index
    %c0_68 = arith.constant 0 : index
    %85 = vector.load %arg9[%c0_65, %c1_66, %c0_67, %c0_68] : memref<2x2x32x16xf32, #tpu.memory_space<vmem>>, vector<1x1x32x16xf32>
    %86 = vector.shape_cast %85 : vector<1x1x32x16xf32> to vector<32x16xf32>
    %cst_69 = arith.constant dense<0.000000e+00> : vector<8x16xf32>
    %87 = tpu.matmul %27, %86, %cst_69 {dimension_numbers = #tpu.dot_dimension_numbers<[1], [0], [0], [1], [0, 0, 1, 1], [], []>} : vector<8x32xf32>, vector<32x16xf32>, vector<8x16xf32> -> vector<8x16xf32>
    %c0_70 = arith.constant 0 : index
    %c1_71 = arith.constant 1 : index
    %c0_72 = arith.constant 0 : index
    %c0_73 = arith.constant 0 : index
    %88 = vector.load %arg10[%c0_70, %c1_71, %c0_72, %c0_73] : memref<2x2x1x16xf32, #tpu.memory_space<vmem>>, vector<1x1x1x16xf32>
    %89 = vector.shape_cast %88 : vector<1x1x1x16xf32> to vector<1x16xf32>
    %90 = vector.broadcast %89 : vector<1x16xf32> to vector<8x16xf32>
    %91 = arith.addf %87, %90 : vector<8x16xf32>
    %cst_74 = arith.constant dense<0.000000e+00> : vector<8x8xf32>
    %92 = tpu.matmul %77, %84, %cst_74 {dimension_numbers = #tpu.dot_dimension_numbers<[1], [1], [0], [0], [0, 0, 1, 0], [], []>} : vector<8x16xf32>, vector<8x16xf32>, vector<8x8xf32> -> vector<8x8xf32>
    %93 = arith.addf %92, %33 : vector<8x8xf32>
    %cst_75 = arith.constant dense<0xFF800000> : vector<8xf32>
    %94 = vector.multi_reduction <maximumf>, %93, %cst_75 [1] : vector<8x8xf32> to vector<8xf32>
    %95 = vector.shape_cast %94 : vector<8xf32> to vector<8x1xf32>
    %96 = vector.broadcast %95 : vector<8x1xf32> to vector<8x8xf32>
    %97 = arith.subf %93, %96 : vector<8x8xf32>
    %98 = math.exp %97 : vector<8x8xf32>
    %cst_76 = arith.constant dense<0.000000e+00> : vector<8xf32>
    %99 = vector.multi_reduction <add>, %98, %cst_76 [1] : vector<8x8xf32> to vector<8xf32>
    %100 = vector.shape_cast %99 : vector<8xf32> to vector<8x1xf32>
    %101 = tpu.reciprocal %100 {approx = true} : vector<8x1xf32> -> vector<8x1xf32>
    %102 = vector.broadcast %101 : vector<8x1xf32> to vector<8x8xf32>
    %103 = arith.mulf %98, %102 : vector<8x8xf32>
    %cst_77 = arith.constant dense<0.000000e+00> : vector<8x16xf32>
    %104 = tpu.matmul %103, %91, %cst_77 {dimension_numbers = #tpu.dot_dimension_numbers<[1], [0], [0], [1], [0, 0, 1, 1], [], []>} : vector<8x8xf32>, vector<8x16xf32>, vector<8x16xf32> -> vector<8x16xf32>
    %c0_78 = arith.constant 0 : index
    %c1_79 = arith.constant 1 : index
    %c0_80 = arith.constant 0 : index
    %c0_81 = arith.constant 0 : index
    %105 = vector.load %arg11[%c0_78, %c1_79, %c0_80, %c0_81] : memref<2x2x16x32xf32, #tpu.memory_space<vmem>>, vector<1x1x16x32xf32>
    %106 = vector.shape_cast %105 : vector<1x1x16x32xf32> to vector<16x32xf32>
    %cst_82 = arith.constant dense<0.000000e+00> : vector<8x32xf32>
    %107 = tpu.matmul %104, %106, %cst_82 {dimension_numbers = #tpu.dot_dimension_numbers<[1], [0], [0], [1], [0, 0, 1, 1], [], []>} : vector<8x16xf32>, vector<16x32xf32>, vector<8x32xf32> -> vector<8x32xf32>
    %108 = arith.addf %70, %107 : vector<8x32xf32>
    %c0_83 = arith.constant 0 : index
    %c0_84 = arith.constant 0 : index
    %c0_85 = arith.constant 0 : index
    %109 = vector.load %arg12[%c0_83, %c0_84, %c0_85] : memref<2x1x32xf32, #tpu.memory_space<vmem>>, vector<1x1x32xf32>
    %110 = vector.shape_cast %109 : vector<1x1x32xf32> to vector<1x32xf32>
    %111 = vector.broadcast %110 : vector<1x32xf32> to vector<8x32xf32>
    %112 = arith.addf %108, %111 : vector<8x32xf32>
    %113 = arith.addf %27, %112 : vector<8x32xf32>
    %c0_86 = arith.constant 0 : index
    %c0_87 = arith.constant 0 : index
    %c0_88 = arith.constant 0 : index
    %114 = vector.load %arg13[%c0_86, %c0_87, %c0_88] : memref<2x1x32xf32, #tpu.memory_space<vmem>>, vector<1x1x32xf32>
    %115 = vector.shape_cast %114 : vector<1x1x32xf32> to vector<1x32xf32>
    %c0_89 = arith.constant 0 : index
    %c0_90 = arith.constant 0 : index
    %c0_91 = arith.constant 0 : index
    %116 = vector.load %arg14[%c0_89, %c0_90, %c0_91] : memref<2x1x32xf32, #tpu.memory_space<vmem>>, vector<1x1x32xf32>
    %117 = vector.shape_cast %116 : vector<1x1x32xf32> to vector<1x32xf32>
    %cst_92 = arith.constant dense<0.000000e+00> : vector<8xf32>
    %118 = vector.multi_reduction <add>, %113, %cst_92 [1] : vector<8x32xf32> to vector<8xf32>
    %119 = vector.shape_cast %118 : vector<8xf32> to vector<8x1xf32>
    %cst_93 = arith.constant 3.200000e+01 : f32
    %120 = vector.broadcast %cst_93 : f32 to vector<8x1xf32>
    %121 = arith.divf %119, %120 : vector<8x1xf32>
    %122 = arith.mulf %113, %113 : vector<8x32xf32>
    %cst_94 = arith.constant dense<0.000000e+00> : vector<8xf32>
    %123 = vector.multi_reduction <add>, %122, %cst_94 [1] : vector<8x32xf32> to vector<8xf32>
    %124 = vector.shape_cast %123 : vector<8xf32> to vector<8x1xf32>
    %cst_95 = arith.constant 3.200000e+01 : f32
    %125 = vector.broadcast %cst_95 : f32 to vector<8x1xf32>
    %126 = arith.divf %124, %125 : vector<8x1xf32>
    %127 = arith.mulf %121, %121 : vector<8x1xf32>
    %128 = arith.subf %126, %127 : vector<8x1xf32>
    %129 = vector.broadcast %121 : vector<8x1xf32> to vector<8x32xf32>
    %130 = arith.subf %113, %129 : vector<8x32xf32>
    %cst_96 = arith.constant 9.99999996E-13 : f32
    %131 = vector.broadcast %cst_96 : f32 to vector<8x1xf32>
    %132 = arith.addf %128, %131 : vector<8x1xf32>
    %133 = math.rsqrt %132 : vector<8x1xf32>
    %134 = vector.broadcast %133 : vector<8x1xf32> to vector<8x32xf32>
    %135 = arith.mulf %130, %134 : vector<8x32xf32>
    %136 = vector.broadcast %115 : vector<1x32xf32> to vector<8x32xf32>
    %137 = arith.mulf %135, %136 : vector<8x32xf32>
    %138 = vector.broadcast %117 : vector<1x32xf32> to vector<8x32xf32>
    %139 = arith.addf %137, %138 : vector<8x32xf32>
    %c0_97 = arith.constant 0 : index
    %c0_98 = arith.constant 0 : index
    %c0_99 = arith.constant 0 : index
    %140 = vector.load %arg15[%c0_97, %c0_98, %c0_99] : memref<2x32x64xf32, #tpu.memory_space<vmem>>, vector<1x32x64xf32>
    %141 = vector.shape_cast %140 : vector<1x32x64xf32> to vector<32x64xf32>
    %cst_100 = arith.constant dense<0.000000e+00> : vector<8x64xf32>
    %142 = tpu.matmul %139, %141, %cst_100 {dimension_numbers = #tpu.dot_dimension_numbers<[1], [0], [0], [1], [0, 0, 1, 1], [], []>} : vector<8x32xf32>, vector<32x64xf32>, vector<8x64xf32> -> vector<8x64xf32>
    %c0_101 = arith.constant 0 : index
    %c0_102 = arith.constant 0 : index
    %c0_103 = arith.constant 0 : index
    %143 = vector.load %arg16[%c0_101, %c0_102, %c0_103] : memref<2x1x64xf32, #tpu.memory_space<vmem>>, vector<1x1x64xf32>
    %144 = vector.shape_cast %143 : vector<1x1x64xf32> to vector<1x64xf32>
    %145 = vector.broadcast %144 : vector<1x64xf32> to vector<8x64xf32>
    %146 = arith.addf %142, %145 : vector<8x64xf32>
    %147 = arith.mulf %146, %146 : vector<8x64xf32>
    %148 = arith.mulf %146, %147 : vector<8x64xf32>
    %cst_104 = arith.constant 4.471500e-02 : f32
    %149 = vector.broadcast %cst_104 : f32 to vector<8x64xf32>
    %150 = arith.mulf %149, %148 : vector<8x64xf32>
    %151 = arith.addf %146, %150 : vector<8x64xf32>
    %cst_105 = arith.constant 0.797884583 : f32
    %152 = vector.broadcast %cst_105 : f32 to vector<8x64xf32>
    %153 = arith.mulf %152, %151 : vector<8x64xf32>
    %154 = math.tanh %153 : vector<8x64xf32>
    %cst_106 = arith.constant 1.000000e+00 : f32
    %155 = vector.broadcast %cst_106 : f32 to vector<8x64xf32>
    %156 = arith.addf %155, %154 : vector<8x64xf32>
    %cst_107 = arith.constant 5.000000e-01 : f32
    %157 = vector.broadcast %cst_107 : f32 to vector<8x64xf32>
    %158 = arith.mulf %157, %156 : vector<8x64xf32>
    %159 = arith.mulf %146, %158 : vector<8x64xf32>
    %c0_108 = arith.constant 0 : index
    %c0_109 = arith.constant 0 : index
    %c0_110 = arith.constant 0 : index
    %160 = vector.load %arg17[%c0_108, %c0_109, %c0_110] : memref<2x64x32xf32, #tpu.memory_space<vmem>>, vector<1x64x32xf32>
    %161 = vector.shape_cast %160 : vector<1x64x32xf32> to vector<64x32xf32>
    %cst_111 = arith.constant dense<0.000000e+00> : vector<8x32xf32>
    %162 = tpu.matmul %159, %161, %cst_111 {dimension_numbers = #tpu.dot_dimension_numbers<[1], [0], [0], [1], [0, 0, 1, 1], [], []>} : vector<8x64xf32>, vector<64x32xf32>, vector<8x32xf32> -> vector<8x32xf32>
    %c0_112 = arith.constant 0 : index
    %c0_113 = arith.constant 0 : index
    %c0_114 = arith.constant 0 : index
    %163 = vector.load %arg18[%c0_112, %c0_113, %c0_114] : memref<2x1x32xf32, #tpu.memory_space<vmem>>, vector<1x1x32xf32>
    %164 = vector.shape_cast %163 : vector<1x1x32xf32> to vector<1x32xf32>
    %165 = vector.broadcast %164 : vector<1x32xf32> to vector<8x32xf32>
    %166 = arith.addf %162, %165 : vector<8x32xf32>
    %167 = arith.addf %139, %166 : vector<8x32xf32>
    %c0_115 = arith.constant 0 : index
    %c0_116 = arith.constant 0 : index
    %c0_117 = arith.constant 0 : index
    %168 = vector.load %arg19[%c0_115, %c0_116, %c0_117] : memref<2x1x32xf32, #tpu.memory_space<vmem>>, vector<1x1x32xf32>
    %169 = vector.shape_cast %168 : vector<1x1x32xf32> to vector<1x32xf32>
    %c0_118 = arith.constant 0 : index
    %c0_119 = arith.constant 0 : index
    %c0_120 = arith.constant 0 : index
    %170 = vector.load %arg20[%c0_118, %c0_119, %c0_120] : memref<2x1x32xf32, #tpu.memory_space<vmem>>, vector<1x1x32xf32>
    %171 = vector.shape_cast %170 : vector<1x1x32xf32> to vector<1x32xf32>
    %cst_121 = arith.constant dense<0.000000e+00> : vector<8xf32>
    %172 = vector.multi_reduction <add>, %167, %cst_121 [1] : vector<8x32xf32> to vector<8xf32>
    %173 = vector.shape_cast %172 : vector<8xf32> to vector<8x1xf32>
    %cst_122 = arith.constant 3.200000e+01 : f32
    %174 = vector.broadcast %cst_122 : f32 to vector<8x1xf32>
    %175 = arith.divf %173, %174 : vector<8x1xf32>
    %176 = arith.mulf %167, %167 : vector<8x32xf32>
    %cst_123 = arith.constant dense<0.000000e+00> : vector<8xf32>
    %177 = vector.multi_reduction <add>, %176, %cst_123 [1] : vector<8x32xf32> to vector<8xf32>
    %178 = vector.shape_cast %177 : vector<8xf32> to vector<8x1xf32>
    %cst_124 = arith.constant 3.200000e+01 : f32
    %179 = vector.broadcast %cst_124 : f32 to vector<8x1xf32>
    %180 = arith.divf %178, %179 : vector<8x1xf32>
    %181 = arith.mulf %175, %175 : vector<8x1xf32>
    %182 = arith.subf %180, %181 : vector<8x1xf32>
    %183 = vector.broadcast %175 : vector<8x1xf32> to vector<8x32xf32>
    %184 = arith.subf %167, %183 : vector<8x32xf32>
    %cst_125 = arith.constant 9.99999996E-13 : f32
    %185 = vector.broadcast %cst_125 : f32 to vector<8x1xf32>
    %186 = arith.addf %182, %185 : vector<8x1xf32>
    %187 = math.rsqrt %186 : vector<8x1xf32>
    %188 = vector.broadcast %187 : vector<8x1xf32> to vector<8x32xf32>
    %189 = arith.mulf %184, %188 : vector<8x32xf32>
    %190 = vector.broadcast %169 : vector<1x32xf32> to vector<8x32xf32>
    %191 = arith.mulf %189, %190 : vector<8x32xf32>
    %192 = vector.broadcast %171 : vector<1x32xf32> to vector<8x32xf32>
    %193 = arith.addf %191, %192 : vector<8x32xf32>
    %c1_126 = arith.constant 1 : index
    %c0_127 = arith.constant 0 : index
    %c0_128 = arith.constant 0 : index
    %c0_129 = arith.constant 0 : index
    %194 = vector.load %arg5[%c1_126, %c0_127, %c0_128, %c0_129] : memref<2x2x32x16xf32, #tpu.memory_space<vmem>>, vector<1x1x32x16xf32>
    %195 = vector.shape_cast %194 : vector<1x1x32x16xf32> to vector<32x16xf32>
    %cst_130 = arith.constant dense<0.000000e+00> : vector<8x16xf32>
    %196 = tpu.matmul %193, %195, %cst_130 {dimension_numbers = #tpu.dot_dimension_numbers<[1], [0], [0], [1], [0, 0, 1, 1], [], []>} : vector<8x32xf32>, vector<32x16xf32>, vector<8x16xf32> -> vector<8x16xf32>
    %c1_131 = arith.constant 1 : index
    %c0_132 = arith.constant 0 : index
    %c0_133 = arith.constant 0 : index
    %c0_134 = arith.constant 0 : index
    %197 = vector.load %arg6[%c1_131, %c0_132, %c0_133, %c0_134] : memref<2x2x1x16xf32, #tpu.memory_space<vmem>>, vector<1x1x1x16xf32>
    %198 = vector.shape_cast %197 : vector<1x1x1x16xf32> to vector<1x16xf32>
    %199 = vector.broadcast %198 : vector<1x16xf32> to vector<8x16xf32>
    %200 = arith.addf %196, %199 : vector<8x16xf32>
    %c1_135 = arith.constant 1 : index
    %c0_136 = arith.constant 0 : index
    %c0_137 = arith.constant 0 : index
    %c0_138 = arith.constant 0 : index
    %201 = vector.load %arg7[%c1_135, %c0_136, %c0_137, %c0_138] : memref<2x2x32x16xf32, #tpu.memory_space<vmem>>, vector<1x1x32x16xf32>
    %202 = vector.shape_cast %201 : vector<1x1x32x16xf32> to vector<32x16xf32>
    %cst_139 = arith.constant dense<0.000000e+00> : vector<8x16xf32>
    %203 = tpu.matmul %193, %202, %cst_139 {dimension_numbers = #tpu.dot_dimension_numbers<[1], [0], [0], [1], [0, 0, 1, 1], [], []>} : vector<8x32xf32>, vector<32x16xf32>, vector<8x16xf32> -> vector<8x16xf32>
    %c1_140 = arith.constant 1 : index
    %c0_141 = arith.constant 0 : index
    %c0_142 = arith.constant 0 : index
    %c0_143 = arith.constant 0 : index
    %204 = vector.load %arg8[%c1_140, %c0_141, %c0_142, %c0_143] : memref<2x2x1x16xf32, #tpu.memory_space<vmem>>, vector<1x1x1x16xf32>
    %205 = vector.shape_cast %204 : vector<1x1x1x16xf32> to vector<1x16xf32>
    %206 = vector.broadcast %205 : vector<1x16xf32> to vector<8x16xf32>
    %207 = arith.addf %203, %206 : vector<8x16xf32>
    %c1_144 = arith.constant 1 : index
    %c0_145 = arith.constant 0 : index
    %c0_146 = arith.constant 0 : index
    %c0_147 = arith.constant 0 : index
    %208 = vector.load %arg9[%c1_144, %c0_145, %c0_146, %c0_147] : memref<2x2x32x16xf32, #tpu.memory_space<vmem>>, vector<1x1x32x16xf32>
    %209 = vector.shape_cast %208 : vector<1x1x32x16xf32> to vector<32x16xf32>
    %cst_148 = arith.constant dense<0.000000e+00> : vector<8x16xf32>
    %210 = tpu.matmul %193, %209, %cst_148 {dimension_numbers = #tpu.dot_dimension_numbers<[1], [0], [0], [1], [0, 0, 1, 1], [], []>} : vector<8x32xf32>, vector<32x16xf32>, vector<8x16xf32> -> vector<8x16xf32>
    %c1_149 = arith.constant 1 : index
    %c0_150 = arith.constant 0 : index
    %c0_151 = arith.constant 0 : index
    %c0_152 = arith.constant 0 : index
    %211 = vector.load %arg10[%c1_149, %c0_150, %c0_151, %c0_152] : memref<2x2x1x16xf32, #tpu.memory_space<vmem>>, vector<1x1x1x16xf32>
    %212 = vector.shape_cast %211 : vector<1x1x1x16xf32> to vector<1x16xf32>
    %213 = vector.broadcast %212 : vector<1x16xf32> to vector<8x16xf32>
    %214 = arith.addf %210, %213 : vector<8x16xf32>
    %cst_153 = arith.constant dense<0.000000e+00> : vector<8x8xf32>
    %215 = tpu.matmul %200, %207, %cst_153 {dimension_numbers = #tpu.dot_dimension_numbers<[1], [1], [0], [0], [0, 0, 1, 0], [], []>} : vector<8x16xf32>, vector<8x16xf32>, vector<8x8xf32> -> vector<8x8xf32>
    %216 = arith.addf %215, %33 : vector<8x8xf32>
    %cst_154 = arith.constant dense<0xFF800000> : vector<8xf32>
    %217 = vector.multi_reduction <maximumf>, %216, %cst_154 [1] : vector<8x8xf32> to vector<8xf32>
    %218 = vector.shape_cast %217 : vector<8xf32> to vector<8x1xf32>
    %219 = vector.broadcast %218 : vector<8x1xf32> to vector<8x8xf32>
    %220 = arith.subf %216, %219 : vector<8x8xf32>
    %221 = math.exp %220 : vector<8x8xf32>
    %cst_155 = arith.constant dense<0.000000e+00> : vector<8xf32>
    %222 = vector.multi_reduction <add>, %221, %cst_155 [1] : vector<8x8xf32> to vector<8xf32>
    %223 = vector.shape_cast %222 : vector<8xf32> to vector<8x1xf32>
    %224 = tpu.reciprocal %223 {approx = true} : vector<8x1xf32> -> vector<8x1xf32>
    %225 = vector.broadcast %224 : vector<8x1xf32> to vector<8x8xf32>
    %226 = arith.mulf %221, %225 : vector<8x8xf32>
    %cst_156 = arith.constant dense<0.000000e+00> : vector<8x16xf32>
    %227 = tpu.matmul %226, %214, %cst_156 {dimension_numbers = #tpu.dot_dimension_numbers<[1], [0], [0], [1], [0, 0, 1, 1], [], []>} : vector<8x8xf32>, vector<8x16xf32>, vector<8x16xf32> -> vector<8x16xf32>
    %c1_157 = arith.constant 1 : index
    %c0_158 = arith.constant 0 : index
    %c0_159 = arith.constant 0 : index
    %c0_160 = arith.constant 0 : index
    %228 = vector.load %arg11[%c1_157, %c0_158, %c0_159, %c0_160] : memref<2x2x16x32xf32, #tpu.memory_space<vmem>>, vector<1x1x16x32xf32>
    %229 = vector.shape_cast %228 : vector<1x1x16x32xf32> to vector<16x32xf32>
    %cst_161 = arith.constant dense<0.000000e+00> : vector<8x32xf32>
    %230 = tpu.matmul %227, %229, %cst_161 {dimension_numbers = #tpu.dot_dimension_numbers<[1], [0], [0], [1], [0, 0, 1, 1], [], []>} : vector<8x16xf32>, vector<16x32xf32>, vector<8x32xf32> -> vector<8x32xf32>
    %c1_162 = arith.constant 1 : index
    %c1_163 = arith.constant 1 : index
    %c0_164 = arith.constant 0 : index
    %c0_165 = arith.constant 0 : index
    %231 = vector.load %arg5[%c1_162, %c1_163, %c0_164, %c0_165] : memref<2x2x32x16xf32, #tpu.memory_space<vmem>>, vector<1x1x32x16xf32>
    %232 = vector.shape_cast %231 : vector<1x1x32x16xf32> to vector<32x16xf32>
    %cst_166 = arith.constant dense<0.000000e+00> : vector<8x16xf32>
    %233 = tpu.matmul %193, %232, %cst_166 {dimension_numbers = #tpu.dot_dimension_numbers<[1], [0], [0], [1], [0, 0, 1, 1], [], []>} : vector<8x32xf32>, vector<32x16xf32>, vector<8x16xf32> -> vector<8x16xf32>
    %c1_167 = arith.constant 1 : index
    %c1_168 = arith.constant 1 : index
    %c0_169 = arith.constant 0 : index
    %c0_170 = arith.constant 0 : index
    %234 = vector.load %arg6[%c1_167, %c1_168, %c0_169, %c0_170] : memref<2x2x1x16xf32, #tpu.memory_space<vmem>>, vector<1x1x1x16xf32>
    %235 = vector.shape_cast %234 : vector<1x1x1x16xf32> to vector<1x16xf32>
    %236 = vector.broadcast %235 : vector<1x16xf32> to vector<8x16xf32>
    %237 = arith.addf %233, %236 : vector<8x16xf32>
    %c1_171 = arith.constant 1 : index
    %c1_172 = arith.constant 1 : index
    %c0_173 = arith.constant 0 : index
    %c0_174 = arith.constant 0 : index
    %238 = vector.load %arg7[%c1_171, %c1_172, %c0_173, %c0_174] : memref<2x2x32x16xf32, #tpu.memory_space<vmem>>, vector<1x1x32x16xf32>
    %239 = vector.shape_cast %238 : vector<1x1x32x16xf32> to vector<32x16xf32>
    %cst_175 = arith.constant dense<0.000000e+00> : vector<8x16xf32>
    %240 = tpu.matmul %193, %239, %cst_175 {dimension_numbers = #tpu.dot_dimension_numbers<[1], [0], [0], [1], [0, 0, 1, 1], [], []>} : vector<8x32xf32>, vector<32x16xf32>, vector<8x16xf32> -> vector<8x16xf32>
    %c1_176 = arith.constant 1 : index
    %c1_177 = arith.constant 1 : index
    %c0_178 = arith.constant 0 : index
    %c0_179 = arith.constant 0 : index
    %241 = vector.load %arg8[%c1_176, %c1_177, %c0_178, %c0_179] : memref<2x2x1x16xf32, #tpu.memory_space<vmem>>, vector<1x1x1x16xf32>
    %242 = vector.shape_cast %241 : vector<1x1x1x16xf32> to vector<1x16xf32>
    %243 = vector.broadcast %242 : vector<1x16xf32> to vector<8x16xf32>
    %244 = arith.addf %240, %243 : vector<8x16xf32>
    %c1_180 = arith.constant 1 : index
    %c1_181 = arith.constant 1 : index
    %c0_182 = arith.constant 0 : index
    %c0_183 = arith.constant 0 : index
    %245 = vector.load %arg9[%c1_180, %c1_181, %c0_182, %c0_183] : memref<2x2x32x16xf32, #tpu.memory_space<vmem>>, vector<1x1x32x16xf32>
    %246 = vector.shape_cast %245 : vector<1x1x32x16xf32> to vector<32x16xf32>
    %cst_184 = arith.constant dense<0.000000e+00> : vector<8x16xf32>
    %247 = tpu.matmul %193, %246, %cst_184 {dimension_numbers = #tpu.dot_dimension_numbers<[1], [0], [0], [1], [0, 0, 1, 1], [], []>} : vector<8x32xf32>, vector<32x16xf32>, vector<8x16xf32> -> vector<8x16xf32>
    %c1_185 = arith.constant 1 : index
    %c1_186 = arith.constant 1 : index
    %c0_187 = arith.constant 0 : index
    %c0_188 = arith.constant 0 : index
    %248 = vector.load %arg10[%c1_185, %c1_186, %c0_187, %c0_188] : memref<2x2x1x16xf32, #tpu.memory_space<vmem>>, vector<1x1x1x16xf32>
    %249 = vector.shape_cast %248 : vector<1x1x1x16xf32> to vector<1x16xf32>
    %250 = vector.broadcast %249 : vector<1x16xf32> to vector<8x16xf32>
    %251 = arith.addf %247, %250 : vector<8x16xf32>
    %cst_189 = arith.constant dense<0.000000e+00> : vector<8x8xf32>
    %252 = tpu.matmul %237, %244, %cst_189 {dimension_numbers = #tpu.dot_dimension_numbers<[1], [1], [0], [0], [0, 0, 1, 0], [], []>} : vector<8x16xf32>, vector<8x16xf32>, vector<8x8xf32> -> vector<8x8xf32>
    %253 = arith.addf %252, %33 : vector<8x8xf32>
    %cst_190 = arith.constant dense<0xFF800000> : vector<8xf32>
    %254 = vector.multi_reduction <maximumf>, %253, %cst_190 [1] : vector<8x8xf32> to vector<8xf32>
    %255 = vector.shape_cast %254 : vector<8xf32> to vector<8x1xf32>
    %256 = vector.broadcast %255 : vector<8x1xf32> to vector<8x8xf32>
    %257 = arith.subf %253, %256 : vector<8x8xf32>
    %258 = math.exp %257 : vector<8x8xf32>
    %cst_191 = arith.constant dense<0.000000e+00> : vector<8xf32>
    %259 = vector.multi_reduction <add>, %258, %cst_191 [1] : vector<8x8xf32> to vector<8xf32>
    %260 = vector.shape_cast %259 : vector<8xf32> to vector<8x1xf32>
    %261 = tpu.reciprocal %260 {approx = true} : vector<8x1xf32> -> vector<8x1xf32>
    %262 = vector.broadcast %261 : vector<8x1xf32> to vector<8x8xf32>
    %263 = arith.mulf %258, %262 : vector<8x8xf32>
    %cst_192 = arith.constant dense<0.000000e+00> : vector<8x16xf32>
    %264 = tpu.matmul %263, %251, %cst_192 {dimension_numbers = #tpu.dot_dimension_numbers<[1], [0], [0], [1], [0, 0, 1, 1], [], []>} : vector<8x8xf32>, vector<8x16xf32>, vector<8x16xf32> -> vector<8x16xf32>
    %c1_193 = arith.constant 1 : index
    %c1_194 = arith.constant 1 : index
    %c0_195 = arith.constant 0 : index
    %c0_196 = arith.constant 0 : index
    %265 = vector.load %arg11[%c1_193, %c1_194, %c0_195, %c0_196] : memref<2x2x16x32xf32, #tpu.memory_space<vmem>>, vector<1x1x16x32xf32>
    %266 = vector.shape_cast %265 : vector<1x1x16x32xf32> to vector<16x32xf32>
    %cst_197 = arith.constant dense<0.000000e+00> : vector<8x32xf32>
    %267 = tpu.matmul %264, %266, %cst_197 {dimension_numbers = #tpu.dot_dimension_numbers<[1], [0], [0], [1], [0, 0, 1, 1], [], []>} : vector<8x16xf32>, vector<16x32xf32>, vector<8x32xf32> -> vector<8x32xf32>
    %268 = arith.addf %230, %267 : vector<8x32xf32>
    %c1_198 = arith.constant 1 : index
    %c0_199 = arith.constant 0 : index
    %c0_200 = arith.constant 0 : index
    %269 = vector.load %arg12[%c1_198, %c0_199, %c0_200] : memref<2x1x32xf32, #tpu.memory_space<vmem>>, vector<1x1x32xf32>
    %270 = vector.shape_cast %269 : vector<1x1x32xf32> to vector<1x32xf32>
    %271 = vector.broadcast %270 : vector<1x32xf32> to vector<8x32xf32>
    %272 = arith.addf %268, %271 : vector<8x32xf32>
    %273 = arith.addf %193, %272 : vector<8x32xf32>
    %c1_201 = arith.constant 1 : index
    %c0_202 = arith.constant 0 : index
    %c0_203 = arith.constant 0 : index
    %274 = vector.load %arg13[%c1_201, %c0_202, %c0_203] : memref<2x1x32xf32, #tpu.memory_space<vmem>>, vector<1x1x32xf32>
    %275 = vector.shape_cast %274 : vector<1x1x32xf32> to vector<1x32xf32>
    %c1_204 = arith.constant 1 : index
    %c0_205 = arith.constant 0 : index
    %c0_206 = arith.constant 0 : index
    %276 = vector.load %arg14[%c1_204, %c0_205, %c0_206] : memref<2x1x32xf32, #tpu.memory_space<vmem>>, vector<1x1x32xf32>
    %277 = vector.shape_cast %276 : vector<1x1x32xf32> to vector<1x32xf32>
    %cst_207 = arith.constant dense<0.000000e+00> : vector<8xf32>
    %278 = vector.multi_reduction <add>, %273, %cst_207 [1] : vector<8x32xf32> to vector<8xf32>
    %279 = vector.shape_cast %278 : vector<8xf32> to vector<8x1xf32>
    %cst_208 = arith.constant 3.200000e+01 : f32
    %280 = vector.broadcast %cst_208 : f32 to vector<8x1xf32>
    %281 = arith.divf %279, %280 : vector<8x1xf32>
    %282 = arith.mulf %273, %273 : vector<8x32xf32>
    %cst_209 = arith.constant dense<0.000000e+00> : vector<8xf32>
    %283 = vector.multi_reduction <add>, %282, %cst_209 [1] : vector<8x32xf32> to vector<8xf32>
    %284 = vector.shape_cast %283 : vector<8xf32> to vector<8x1xf32>
    %cst_210 = arith.constant 3.200000e+01 : f32
    %285 = vector.broadcast %cst_210 : f32 to vector<8x1xf32>
    %286 = arith.divf %284, %285 : vector<8x1xf32>
    %287 = arith.mulf %281, %281 : vector<8x1xf32>
    %288 = arith.subf %286, %287 : vector<8x1xf32>
    %289 = vector.broadcast %281 : vector<8x1xf32> to vector<8x32xf32>
    %290 = arith.subf %273, %289 : vector<8x32xf32>
    %cst_211 = arith.constant 9.99999996E-13 : f32
    %291 = vector.broadcast %cst_211 : f32 to vector<8x1xf32>
    %292 = arith.addf %288, %291 : vector<8x1xf32>
    %293 = math.rsqrt %292 : vector<8x1xf32>
    %294 = vector.broadcast %293 : vector<8x1xf32> to vector<8x32xf32>
    %295 = arith.mulf %290, %294 : vector<8x32xf32>
    %296 = vector.broadcast %275 : vector<1x32xf32> to vector<8x32xf32>
    %297 = arith.mulf %295, %296 : vector<8x32xf32>
    %298 = vector.broadcast %277 : vector<1x32xf32> to vector<8x32xf32>
    %299 = arith.addf %297, %298 : vector<8x32xf32>
    %c1_212 = arith.constant 1 : index
    %c0_213 = arith.constant 0 : index
    %c0_214 = arith.constant 0 : index
    %300 = vector.load %arg15[%c1_212, %c0_213, %c0_214] : memref<2x32x64xf32, #tpu.memory_space<vmem>>, vector<1x32x64xf32>
    %301 = vector.shape_cast %300 : vector<1x32x64xf32> to vector<32x64xf32>
    %cst_215 = arith.constant dense<0.000000e+00> : vector<8x64xf32>
    %302 = tpu.matmul %299, %301, %cst_215 {dimension_numbers = #tpu.dot_dimension_numbers<[1], [0], [0], [1], [0, 0, 1, 1], [], []>} : vector<8x32xf32>, vector<32x64xf32>, vector<8x64xf32> -> vector<8x64xf32>
    %c1_216 = arith.constant 1 : index
    %c0_217 = arith.constant 0 : index
    %c0_218 = arith.constant 0 : index
    %303 = vector.load %arg16[%c1_216, %c0_217, %c0_218] : memref<2x1x64xf32, #tpu.memory_space<vmem>>, vector<1x1x64xf32>
    %304 = vector.shape_cast %303 : vector<1x1x64xf32> to vector<1x64xf32>
    %305 = vector.broadcast %304 : vector<1x64xf32> to vector<8x64xf32>
    %306 = arith.addf %302, %305 : vector<8x64xf32>
    %307 = arith.mulf %306, %306 : vector<8x64xf32>
    %308 = arith.mulf %306, %307 : vector<8x64xf32>
    %cst_219 = arith.constant 4.471500e-02 : f32
    %309 = vector.broadcast %cst_219 : f32 to vector<8x64xf32>
    %310 = arith.mulf %309, %308 : vector<8x64xf32>
    %311 = arith.addf %306, %310 : vector<8x64xf32>
    %cst_220 = arith.constant 0.797884583 : f32
    %312 = vector.broadcast %cst_220 : f32 to vector<8x64xf32>
    %313 = arith.mulf %312, %311 : vector<8x64xf32>
    %314 = math.tanh %313 : vector<8x64xf32>
    %cst_221 = arith.constant 1.000000e+00 : f32
    %315 = vector.broadcast %cst_221 : f32 to vector<8x64xf32>
    %316 = arith.addf %315, %314 : vector<8x64xf32>
    %cst_222 = arith.constant 5.000000e-01 : f32
    %317 = vector.broadcast %cst_222 : f32 to vector<8x64xf32>
    %318 = arith.mulf %317, %316 : vector<8x64xf32>
    %319 = arith.mulf %306, %318 : vector<8x64xf32>
    %c1_223 = arith.constant 1 : index
    %c0_224 = arith.constant 0 : index
    %c0_225 = arith.constant 0 : index
    %320 = vector.load %arg17[%c1_223, %c0_224, %c0_225] : memref<2x64x32xf32, #tpu.memory_space<vmem>>, vector<1x64x32xf32>
    %321 = vector.shape_cast %320 : vector<1x64x32xf32> to vector<64x32xf32>
    %cst_226 = arith.constant dense<0.000000e+00> : vector<8x32xf32>
    %322 = tpu.matmul %319, %321, %cst_226 {dimension_numbers = #tpu.dot_dimension_numbers<[1], [0], [0], [1], [0, 0, 1, 1], [], []>} : vector<8x64xf32>, vector<64x32xf32>, vector<8x32xf32> -> vector<8x32xf32>
    %c1_227 = arith.constant 1 : index
    %c0_228 = arith.constant 0 : index
    %c0_229 = arith.constant 0 : index
    %323 = vector.load %arg18[%c1_227, %c0_228, %c0_229] : memref<2x1x32xf32, #tpu.memory_space<vmem>>, vector<1x1x32xf32>
    %324 = vector.shape_cast %323 : vector<1x1x32xf32> to vector<1x32xf32>
    %325 = vector.broadcast %324 : vector<1x32xf32> to vector<8x32xf32>
    %326 = arith.addf %322, %325 : vector<8x32xf32>
    %327 = arith.addf %299, %326 : vector<8x32xf32>
    %c1_230 = arith.constant 1 : index
    %c0_231 = arith.constant 0 : index
    %c0_232 = arith.constant 0 : index
    %328 = vector.load %arg19[%c1_230, %c0_231, %c0_232] : memref<2x1x32xf32, #tpu.memory_space<vmem>>, vector<1x1x32xf32>
    %329 = vector.shape_cast %328 : vector<1x1x32xf32> to vector<1x32xf32>
    %c1_233 = arith.constant 1 : index
    %c0_234 = arith.constant 0 : index
    %c0_235 = arith.constant 0 : index
    %330 = vector.load %arg20[%c1_233, %c0_234, %c0_235] : memref<2x1x32xf32, #tpu.memory_space<vmem>>, vector<1x1x32xf32>
    %331 = vector.shape_cast %330 : vector<1x1x32xf32> to vector<1x32xf32>
    %cst_236 = arith.constant dense<0.000000e+00> : vector<8xf32>
    %332 = vector.multi_reduction <add>, %327, %cst_236 [1] : vector<8x32xf32> to vector<8xf32>
    %333 = vector.shape_cast %332 : vector<8xf32> to vector<8x1xf32>
    %cst_237 = arith.constant 3.200000e+01 : f32
    %334 = vector.broadcast %cst_237 : f32 to vector<8x1xf32>
    %335 = arith.divf %333, %334 : vector<8x1xf32>
    %336 = arith.mulf %327, %327 : vector<8x32xf32>
    %cst_238 = arith.constant dense<0.000000e+00> : vector<8xf32>
    %337 = vector.multi_reduction <add>, %336, %cst_238 [1] : vector<8x32xf32> to vector<8xf32>
    %338 = vector.shape_cast %337 : vector<8xf32> to vector<8x1xf32>
    %cst_239 = arith.constant 3.200000e+01 : f32
    %339 = vector.broadcast %cst_239 : f32 to vector<8x1xf32>
    %340 = arith.divf %338, %339 : vector<8x1xf32>
    %341 = arith.mulf %335, %335 : vector<8x1xf32>
    %342 = arith.subf %340, %341 : vector<8x1xf32>
    %343 = vector.broadcast %335 : vector<8x1xf32> to vector<8x32xf32>
    %344 = arith.subf %327, %343 : vector<8x32xf32>
    %cst_240 = arith.constant 9.99999996E-13 : f32
    %345 = vector.broadcast %cst_240 : f32 to vector<8x1xf32>
    %346 = arith.addf %342, %345 : vector<8x1xf32>
    %347 = math.rsqrt %346 : vector<8x1xf32>
    %348 = vector.broadcast %347 : vector<8x1xf32> to vector<8x32xf32>
    %349 = arith.mulf %344, %348 : vector<8x32xf32>
    %350 = vector.broadcast %329 : vector<1x32xf32> to vector<8x32xf32>
    %351 = arith.mulf %349, %350 : vector<8x32xf32>
    %352 = vector.broadcast %331 : vector<1x32xf32> to vector<8x32xf32>
    %353 = arith.addf %351, %352 : vector<8x32xf32>
    %354 = vector.extract_strided_slice %353 {offsets = [1, 0], sizes = [6, 32], strides = [1, 1]} : vector<8x32xf32> to vector<6x32xf32>
    %355 = vector.extract_strided_slice %353 {offsets = [2, 0], sizes = [6, 32], strides = [1, 1]} : vector<8x32xf32> to vector<6x32xf32>
    %356 = tpu.iota {dimensions = array<i32: 0>} : vector<6x1xi32>
    %c2_i32 = arith.constant 2 : i32
    %357 = arith.subi %1, %c2_i32 : i32
    %358 = vector.broadcast %357 : i32 to vector<6x1xi32>
    %359 = arith.cmpi slt, %356, %358 : vector<6x1xi32>
    %360 = vector.shape_cast %359 : vector<6x1xi1> to vector<6x1xi1>
    %361 = vector.broadcast %360 : vector<6x1xi1> to vector<6x32xi1>
    %362 = arith.select %361, %354, %355 : vector<6x32xi1>, vector<6x32xf32>
    %c0_241 = arith.constant 0 : index
    %c0_242 = arith.constant 0 : index
    %c0_243 = arith.constant 0 : index
    %363 = vector.load %arg21[%c0_241, %c0_242, %c0_243] : memref<1x6x32xf32, #tpu.memory_space<vmem>>, vector<1x6x32xf32>
    %364 = vector.shape_cast %363 : vector<1x6x32xf32> to vector<6x32xf32>
    %365 = vector.shape_cast %362 : vector<6x32xf32> to vector<1x6x32xf32>
    tpu.vector_store %arg21[%c0_241, %c0_242, %c0_243], %365 {strides = array<i32>} : memref<1x6x32xf32, #tpu.memory_space<vmem>>, vector<1x6x32xf32>,
    return
  }
  func.func @transform_0(%arg0: i32, %arg1: memref<2xi32, #tpu.memory_space<smem>>) -> (i32, i32, i32) {
    %c0_i32 = arith.constant 0 : i32
    %c0_i32_0 = arith.constant 0 : i32
    %c0_i32_1 = arith.constant 0 : i32
    return %arg0, %c0_i32, %c0_i32_0 : i32, i32, i32
  }
  func.func @transform_1(%arg0: i32, %arg1: memref<2xi32, #tpu.memory_space<smem>>) -> (i32, i32) {
    %c0_i32 = arith.constant 0 : i32
    %c0_i32_0 = arith.constant 0 : i32
    %c0_i32_1 = arith.constant 0 : i32
    return %c0_i32, %c0_i32_0 : i32, i32
  }
  func.func @transform_2(%arg0: i32, %arg1: memref<2xi32, #tpu.memory_space<smem>>) -> (i32, i32) {
    %c0_i32 = arith.constant 0 : i32
    %c0_i32_0 = arith.constant 0 : i32
    %c0_i32_1 = arith.constant 0 : i32
    return %c0_i32, %c0_i32_0 : i32, i32
  }
  func.func @transform_3(%arg0: i32, %arg1: memref<2xi32, #tpu.memory_space<smem>>) -> (i32, i32, i32, i32) {
    %c0_i32 = arith.constant 0 : i32
    %c0_i32_0 = arith.constant 0 : i32
    %c0_i32_1 = arith.constant 0 : i32
    %c0_i32_2 = arith.constant 0 : i32
    %c0_i32_3 = arith.constant 0 : i32
    return %c0_i32, %c0_i32_0, %c0_i32_1, %c0_i32_2 : i32, i32, i32, i32
  }
  func.func @transform_4(%arg0: i32, %arg1: memref<2xi32, #tpu.memory_space<smem>>) -> (i32, i32, i32, i32) {
    %c0_i32 = arith.constant 0 : i32
    %c0_i32_0 = arith.constant 0 : i32
    %c0_i32_1 = arith.constant 0 : i32
    %c0_i32_2 = arith.constant 0 : i32
    %c0_i32_3 = arith.constant 0 : i32
    return %c0_i32, %c0_i32_0, %c0_i32_1, %c0_i32_2 : i32, i32, i32, i32
  }
  func.func @transform_5(%arg0: i32, %arg1: memref<2xi32, #tpu.memory_space<smem>>) -> (i32, i32, i32, i32) {
    %c0_i32 = arith.constant 0 : i32
    %c0_i32_0 = arith.constant 0 : i32
    %c0_i32_1 = arith.constant 0 : i32
    %c0_i32_2 = arith.constant 0 : i32
    %c0_i32_3 = arith.constant 0 : i32
    return %c0_i32, %c0_i32_0, %c0_i32_1, %c0_i32_2 : i32, i32, i32, i32
  }
  func.func @transform_6(%arg0: i32, %arg1: memref<2xi32, #tpu.memory_space<smem>>) -> (i32, i32, i32, i32) {
    %c0_i32 = arith.constant 0 : i32
    %c0_i32_0 = arith.constant 0 : i32
    %c0_i32_1 = arith.constant 0 : i32
    %c0_i32_2 = arith.constant 0 : i32
    %c0_i32_3 = arith.constant 0 : i32
    return %c0_i32, %c0_i32_0, %c0_i32_1, %c0_i32_2 : i32, i32, i32, i32
  }
  func.func @transform_7(%arg0: i32, %arg1: memref<2xi32, #tpu.memory_space<smem>>) -> (i32, i32, i32, i32) {
    %c0_i32 = arith.constant 0 : i32
    %c0_i32_0 = arith.constant 0 : i32
    %c0_i32_1 = arith.constant 0 : i32
    %c0_i32_2 = arith.constant 0 : i32
    %c0_i32_3 = arith.constant 0 : i32
    return %c0_i32, %c0_i32_0, %c0_i32_1, %c0_i32_2 : i32, i32, i32, i32
  }
  func.func @transform_8(%arg0: i32, %arg1: memref<2xi32, #tpu.memory_space<smem>>) -> (i32, i32, i32, i32) {
    %c0_i32 = arith.constant 0 : i32
    %c0_i32_0 = arith.constant 0 : i32
    %c0_i32_1 = arith.constant 0 : i32
    %c0_i32_2 = arith.constant 0 : i32
    %c0_i32_3 = arith.constant 0 : i32
    return %c0_i32, %c0_i32_0, %c0_i32_1, %c0_i32_2 : i32, i32, i32, i32
  }
  func.func @transform_9(%arg0: i32, %arg1: memref<2xi32, #tpu.memory_space<smem>>) -> (i32, i32, i32, i32) {
    %c0_i32 = arith.constant 0 : i32
    %c0_i32_0 = arith.constant 0 : i32
    %c0_i32_1 = arith.constant 0 : i32
    %c0_i32_2 = arith.constant 0 : i32
    %c0_i32_3 = arith.constant 0 : i32
    return %c0_i32, %c0_i32_0, %c0_i32_1, %c0_i32_2 : i32, i32, i32, i32
  }
  func.func @transform_10(%arg0: i32, %arg1: memref<2xi32, #tpu.memory_space<smem>>) -> (i32, i32, i32) {
    %c0_i32 = arith.constant 0 : i32
    %c0_i32_0 = arith.constant 0 : i32
    %c0_i32_1 = arith.constant 0 : i32
    %c0_i32_2 = arith.constant 0 : i32
    return %c0_i32, %c0_i32_0, %c0_i32_1 : i32, i32, i32
  }
  func.func @transform_11(%arg0: i32, %arg1: memref<2xi32, #tpu.memory_space<smem>>) -> (i32, i32, i32) {
    %c0_i32 = arith.constant 0 : i32
    %c0_i32_0 = arith.constant 0 : i32
    %c0_i32_1 = arith.constant 0 : i32
    %c0_i32_2 = arith.constant 0 : i32
    return %c0_i32, %c0_i32_0, %c0_i32_1 : i32, i32, i32
  }
  func.func @transform_12(%arg0: i32, %arg1: memref<2xi32, #tpu.memory_space<smem>>) -> (i32, i32, i32) {
    %c0_i32 = arith.constant 0 : i32
    %c0_i32_0 = arith.constant 0 : i32
    %c0_i32_1 = arith.constant 0 : i32
    %c0_i32_2 = arith.constant 0 : i32
    return %c0_i32, %c0_i32_0, %c0_i32_1 : i32, i32, i32
  }
  func.func @transform_13(%arg0: i32, %arg1: memref<2xi32, #tpu.memory_space<smem>>) -> (i32, i32, i32) {
    %c0_i32 = arith.constant 0 : i32
    %c0_i32_0 = arith.constant 0 : i32
    %c0_i32_1 = arith.constant 0 : i32
    %c0_i32_2 = arith.constant 0 : i32
    return %c0_i32, %c0_i32_0, %c0_i32_1 : i32, i32, i32
  }
  func.func @transform_14(%arg0: i32, %arg1: memref<2xi32, #tpu.memory_space<smem>>) -> (i32, i32, i32) {
    %c0_i32 = arith.constant 0 : i32
    %c0_i32_0 = arith.constant 0 : i32
    %c0_i32_1 = arith.constant 0 : i32
    %c0_i32_2 = arith.constant 0 : i32
    return %c0_i32, %c0_i32_0, %c0_i32_1 : i32, i32, i32
  }
  func.func @transform_15(%arg0: i32, %arg1: memref<2xi32, #tpu.memory_space<smem>>) -> (i32, i32, i32) {
    %c0_i32 = arith.constant 0 : i32
    %c0_i32_0 = arith.constant 0 : i32
    %c0_i32_1 = arith.constant 0 : i32
    %c0_i32_2 = arith.constant 0 : i32
    return %c0_i32, %c0_i32_0, %c0_i32_1 : i32, i32, i32
  }
  func.func @transform_16(%arg0: i32, %arg1: memref<2xi32, #tpu.memory_space<smem>>) -> (i32, i32, i32) {
    %c0_i32 = arith.constant 0 : i32
    %c0_i32_0 = arith.constant 0 : i32
    %c0_i32_1 = arith.constant 0 : i32
    %c0_i32_2 = arith.constant 0 : i32
    return %c0_i32, %c0_i32_0, %c0_i32_1 : i32, i32, i32
  }
  func.func @transform_17(%arg0: i32, %arg1: memref<2xi32, #tpu.memory_space<smem>>) -> (i32, i32, i32) {
    %c0_i32 = arith.constant 0 : i32
    %c0_i32_0 = arith.constant 0 : i32
    %c0_i32_1 = arith.constant 0 : i32
    %c0_i32_2 = arith.constant 0 : i32
    return %c0_i32, %c0_i32_0, %c0_i32_1 : i32, i32, i32
  }
  func.func @transform_18(%arg0: i32, %arg1: memref<2xi32, #tpu.memory_space<smem>>) -> (i32, i32, i32) {
    %c0_i32 = arith.constant 0 : i32
    %c0_i32_0 = arith.constant 0 : i32
    %c0_i32_1 = arith.constant 0 : i32
    %c0_i32_2 = arith.constant 0 : i32
    return %c0_i32, %c0_i32_0, %c0_i32_1 : i32, i32, i32
  }
  func.func @transform_19(%arg0: i32, %arg1: memref<2xi32, #tpu.memory_space<smem>>) -> (i32, i32, i32) {
    %c0_i32 = arith.constant 0 : i32
    %c0_i32_0 = arith.constant 0 : i32
    %c0_i32_1 = arith.constant 0 : i32
    return %arg0, %c0_i32, %c0_i32_0 : i32, i32, i32
  }
}

</mosaic_0001>

<bundles_post_ra>
// kernel: tpu_custom_call.1
= control target key start
LH: loop header
LB: loop body
LE: loop exit
PB: predicated region body
PF: predicated region fallthrough
CT: control target
= control target key end

     0   :  { %s4521_s0 = inlined_call_operand.vmem [shape: s32[2], index: 0, kind: input, shape index: {}]   ;;  %s4522_s1 = inlined_call_operand.vmem [shape: f32[2,8,32], index: 1, kind: input, shape index: {}]   ;;  %s4523_s2 = inlined_call_operand.vmem [shape: f32[1,32], index: 2, kind: input, shape index: {}]   ;;  %s4524_s3 = inlined_call_operand.vmem [shape: f32[1,32], index: 3, kind: input, shape index: {}]   ;;  %s4525_s4 = inlined_call_operand.vmem [shape: f32[2,2,32,16], index: 4, kind: input, shape index: {}]   ;;  %s4526_s5 = inlined_call_operand.vmem [shape: f32[2,2,1,16], index: 5, kind: input, shape index: {}]   ;;  %s4527_s6 = inlined_call_operand.vmem [shape: f32[2,2,32,16], index: 6, kind: input, shape index: {}]   ;;  %s4528_s7 = inlined_call_operand.vmem [shape: f32[2,2,1,16], index: 7, kind: input, shape index: {}]   ;;  %s4529_s8 = inlined_call_operand.vmem [shape: f32[2,2,32,16], index: 8, kind: input, shape index: {}]   ;;  %s4530_s9 = inlined_call_operand.vmem [shape: f32[2,2,1,16], index: 9, kind: input, shape index: {}]   ;;  %s4531_s10 = inlined_call_operand.vmem [shape: f32[2,2,16,32], index: 10, kind: input, shape index: {}]   ;;  %s4532_s11 = inlined_call_operand.vmem [shape: f32[2,1,32], index: 11, kind: input, shape index: {}]   ;;  %s4533_s12 = inlined_call_operand.vmem [shape: f32[2,1,32], index: 12, kind: input, shape index: {}]   ;;  %s4534_s13 = inlined_call_operand.vmem [shape: f32[2,1,32], index: 13, kind: input, shape index: {}]   ;;  %s4535_s14 = inlined_call_operand.vmem [shape: f32[2,32,64], index: 14, kind: input, shape index: {}]   ;;  %s4536_s15 = inlined_call_operand.vmem [shape: f32[2,1,64], index: 15, kind: input, shape index: {}]   ;;  %s4537_s16 = inlined_call_operand.vmem [shape: f32[2,64,32], index: 16, kind: input, shape index: {}]   ;;  %s4538_s17 = inlined_call_operand.vmem [shape: f32[2,1,32], index: 17, kind: input, shape index: {}]   ;;  %s4539_s18 = inlined_call_operand.vmem [shape: f32[2,1,32], index: 18, kind: input, shape index: {}]   ;;  %s4540_s19 = inlined_call_operand.vmem [shape: f32[2,1,32], index: 19, kind: input, shape index: {}]   ;;  %s4541_s20 = inlined_call_operand.vmem [shape: f32[2,6,32], index: 20, kind: output, shape index: {}]  }
   0x1   :  { %4544 = sst [smem:[#allocation5_spill]] %s4521_s0 }
   0x2   :  { %4545 = sst [smem:[#allocation6_spill]] %s4522_s1  ;;  %s4550_s23 = sld [smem:[#allocation5_spill]] }
   0x3   :  { %4546 = sst [smem:[#allocation7_spill]] %s4523_s2 }
   0x4   :  { %4547 = sst [smem:[#allocation8_spill]] %s4524_s3 }
   0x5   :  { %4548 = sst [smem:[#allocation9_spill]] %s4525_s4 }
   0x6   :  { %4549 = sst [smem:[#allocation10_spill]] %s4534_s13 }
   0x8   :  { %s25_s13 = sshll.u32 %s4550_s23, 4  ;;  %s26_s13 = int_to_ptr.vmem [resolvable:$true] %s25_s13 }
   0x9   :  { %s3849_s24 = scalar_lea.vmem %s26_s13, 16  ;;  %p3854_p1 = scmp.lt.s32.totalorder %s26_s13, %s26_s13 }
   0xa   :  { %p3850_p0 = scmp.ne.s32.totalorder %s26_s13, %s3849_s24  ;;  %p3855_p2 = scmp.lt.s32.totalorder %s3849_s24, %s3849_s24 }
   0xc   :  { %p3856_p3 = por %p3855_p2, %p3854_p1 }
   0xe   :  { %p3857_p4 = pnand %p3856_p3, %p3850_p0 }
  0x10   :  { %3860 = shalt.err (!%p3857_p4)  }
  0x11   :  { %s3871_s2 = smov [#allocation3]  }
  0x12   :  { %28 = dma.vmem_to_smem %s26_s13, 16, %s3871_s2, [#allocation2] }
  0x13   :  { %3865 = dma.done.wait [#allocation2], 16 }
  0x14   :  { %3866 = vsyncadd [#allocation2], 4294967280 }
  0x15   :  { %30 = sfence }
  0x16   :  { %s3984_s25 = smov 0  }
  0x17 LB: > { %s3990_s3 = sadd.s32 4294967295, %s3869_s25   ;;  %p3174_p5 = scmp.ge.s32.totalorder %s3869_s25, 1  ;;  %s3869_s25 = sphi %s3984_s25, %s36_s25  }
  0x18   : > { %p543_p6 = scmp.lt.s32.totalorder %s3869_s25, 3 }
  0x1a   : > { %p544_p7 = pnand %p3174_p5, %p543_p6 }
  0x1b   : > { %p597_p8 = scmp.lt.s32.totalorder (!%p544_p7), %s3990_s3, 1  ;;  %vm609_vm0 = vcmask (!%p544_p7), 261120   ;;  %s4551_s4 = sld [smem:[#allocation6_spill]] (!%p544_p7)  ;;  %v729_v7 = vld [vmem:[%s4527_s6] sm:$0xff] (!%p544_p7)  ;;  %v730_v8 = vld [vmem:[%s4527_s6 + $0x8] sm:$0xff] (!%p544_p7)  ;;  %v3872_v9 = vmov (!%p544_p7), 0.0|0.0   ;;  %v640_v62 = vlaneseq (!%p544_p7) }
  0x1c   : > { %547 = sbr.rel (%p544_p7) target bundleno = 5664 (0x1620), region = 96  ;;  %s4552_s21 = sld [smem:[#allocation9_spill]] (!%p544_p7)  ;;  %3686 = vmatprep.subr.bf16.mxu0 (!%p544_p7), %v3872_v9  ;;  %3692 = vmatprep.subr.bf16.mxu1 (!%p544_p7), %v3872_v9  ;;  %v3693_v10 = vpack.c.bf16 (!%p544_p7), %v730_v8, %v729_v7  ;;  %v731_v14 = vld [vmem:[%s4527_s6 + $0x10] sm:$0xff] (!%p544_p7)  ;;  %v732_v15 = vld [vmem:[%s4527_s6 + $0x18] sm:$0xff] (!%p544_p7)  ;;  %vm3873_vm1 = vmmov (!%p544_p7), 0   ;;  %v3874_v17 = vmov (!%p544_p7), 0.0  }
  0x1d   : > { %v3696_v16 = vpack.c.bf16 (!%p544_p7), %v732_v15, %v731_v14  ;;  %3434 = vmatprep.mubr.msk.f32.mxu0 (!%p544_p7), %vm3873_vm1, %v3874_v17  ;;  %3445 = vmatprep.mubr.msk.f32.mxu1 (!%p544_p7), %vm3873_vm1, %v3874_v17  ;;  %s4553_s27 = sld [smem:[#allocation7_spill]] (!%p544_p7)  ;;  %v810_v29 = vld [vmem:[%s4529_s8] sm:$0xff] (!%p544_p7)  ;;  %v811_v30 = vld [vmem:[%s4529_s8 + $0x8] sm:$0xff] (!%p544_p7)  ;;  %s4554_s22 = sld [smem:[#allocation8_spill]] (!%p544_p7)  ;;  %v812_v35 = vld [vmem:[%s4529_s8 + $0x10] sm:$0xff] (!%p544_p7)  ;;  %vm891_vm2 = vcmask (!%p544_p7), 130048  }
  0x1e   : > { %3694 = vmatpush3.bf16.msra.mxu1 (!%p544_p7), %v3693_v10  ;;  %v3699_v33 = vpack.c.bf16 (!%p544_p7), %v811_v30, %v810_v29  ;;  %v813_v36 = vld [vmem:[%s4529_s8 + $0x18] sm:$0xff] (!%p544_p7)  ;;  %v3181_v38 = vld [vmem:[%s4528_s7] ss:$0 sm:$0xff] (!%p544_p7)  ;;  %v3203_v55 = vld [vmem:[%s4529_s8 + $0x28] sm:$0xff] (!%p544_p7)  ;;  %s4126_s28 = sld [smem:[#allocation3 + %s3990_s3]] (!%p544_p7)  ;;  %v641_v63 = vand.u32 (!%p544_p7), 127, %v640_v62 }
  0x1f   : > { %3695 = vmatprep.subr.bf16.mxu1 (!%p544_p7), %v3872_v9  ;;  %v3702_v37 = vpack.c.bf16 (!%p544_p7), %v813_v36, %v812_v35  ;;  %v3179_v43 = vld [vmem:[%s4526_s5] ss:$0 sm:$0xff] (!%p544_p7)  ;;  %v3204_v59 = vld [vmem:[%s4529_s8 + $0x30] sm:$0xff] (!%p544_p7)  ;;  %v3205_v60 = vld [vmem:[%s4529_s8 + $0x38] sm:$0xff] (!%p544_p7)  ;;  %vm968_vm4 = vcmask (!%p544_p7), 64512   ;;  %s4555_s30 = sld [smem:[#allocation10_spill]] (!%p544_p7) }
  0x20   : > { %v3183_v51 = vld [vmem:[%s4530_s9] ss:$0 sm:$0xff] (!%p544_p7)  ;;  %v3720_v61 = vpack.c.bf16 (!%p544_p7), %v3205_v60, %v3204_v59  ;;  %v3200_v29 = vld [vmem:[%s4528_s7 + $0x1] ss:$0 sm:$0xff] (!%p544_p7)  ;;  %vm1761_vm5 = vcmask (!%p544_p7), 523264   ;;  %vm3115_vm7 = vcmask (!%p544_p7), 259072  }
  0x21   : > { %v3202_v54 = vld [vmem:[%s4529_s8 + $0x20] sm:$0xff] (!%p544_p7) }
  0x22   : > { %v645_v4 = vld [vmem:[%s4552_s21] sm:$0xff] (!%p544_p7)  ;;  %v646_v5 = vld [vmem:[%s4552_s21 + $0x8] sm:$0xff] (!%p544_p7)  ;;  %v647_v11 = vld [vmem:[%s4552_s21 + $0x10] sm:$0xff] (!%p544_p7)  ;;  %3697 = vmatpush3.bf16.msra.mxu1 (!%p544_p7), %v3696_v16  ;;  %v3717_v58 = vpack.c.bf16 (!%p544_p7), %v3203_v55, %v3202_v54 }
  0x23   : > { %s3996_s13 = scalar_select %p597_p8, %s3990_s3, 1  ;;  %v3687_v6 = vpack.c.bf16 %v646_v5, %v645_v4  ;;  %v648_v12 = vld [vmem:[%s4552_s21 + $0x18] sm:$0xff]  ;;  %3464 = vmatprep.subr.mxu1 %v3874_v17  ;;  %v3177_v27 = vld [vmem:[%s4553_s27] ss:$0 sm:$0xff]  ;;  %v3189_v42 = vld [vmem:[%s4552_s21 + $0x28] sm:$0xff] }
  0x24   : > { %v3690_v13 = vpack.c.bf16 %v648_v12, %v647_v11  ;;  %v3178_v31 = vld [vmem:[%s4554_s22] ss:$0 sm:$0xff]  ;;  %v3190_v49 = vld [vmem:[%s4552_s21 + $0x30] sm:$0xff]  ;;  %v3191_v50 = vld [vmem:[%s4552_s21 + $0x38] sm:$0xff]  ;;  %s3307_s27 = sadd.s32 4294967294, %s4126_s28 }
  0x25   : > { %s3175_s26 = sshll.u32 %s3996_s13, 3  ;;  %3688 = vmatpush3.bf16.msra.mxu0 %v3687_v6  ;;  %v3188_v41 = vld [vmem:[%s4552_s21 + $0x20] sm:$0xff]  ;;  %v3708_v52 = vpack.c.bf16 %v3191_v50, %v3190_v49 }
  0x26   : > { %s600_s29 = scalar_lea.vmem %s4551_s4, %s3175_s26  ;;  %3689 = vmatprep.subr.bf16.mxu0 %v3872_v9  ;;  %v3705_v47 = vpack.c.bf16 %v3189_v42, %v3188_v41  ;;  %v3207_v35 = vld [vmem:[%s4530_s9 + $0x1] ss:$0 sm:$0xff] }
  0x27   : > { %v606_v0 = vld [vmem:[%s600_s29] sm:$0xff] }
  0x28   : > { %v610_v1 = vsel %vm609_vm0, %v606_v0, 0.0  ;;  %v615_v2 = vmul.f32 %v606_v0, %v606_v0 }
  0x29   : > { %611 = vadd.xlane.f32.xlu0 %v610_v1  ;;  %3691 = vmatpush3.bf16.msra.mxu0 %v3690_v13  ;;  %v3875_v1 = vmov -1e+09  }
  0x2a   : > { %v616_v3 = vsel %vm609_vm0, %v615_v2, 0.0  ;;  %3698 = vmatprep.subr.bf16.mxu0 %v3872_v9 }
  0x2d   : > { %617 = vadd.xlane.f32.xlu0 %v616_v3 }
  0xb6   : > { %v612_v18 = vpop.xlane.xlu0 %611 }
  0xb7   : > { %v614_v19 = vmul.f32 0.03125, %v612_v18 }
  0xb9   : > { %v620_v21 = vmul.f32 %v614_v19, %v614_v19  ;;  %v622_v25 = vsub.f32 %v606_v0, %v614_v19  ;;  %v642_v0 = vstv %s4126_s28  ;;  %v3195_v19 = vld [vmem:[%s4527_s6 + $0x20] sm:$0xff]  ;;  %s604_s28 = scalar_lea.vmem %s4541_s20, %s3175_s26 }
  0xba   : > { %v618_v20 = vpop.xlane.xlu0 %617  ;;  %vm643_vm3 = vcmp.lt.s32.totalorder %v641_v63, %v642_v0 }
  0xbb   : > { %v619_v22 = vmul.f32 0.03125, %v618_v20  ;;  %v4130_v2 = vsel %vm643_vm3, 0.0, %v3875_v1  ;;  %v3196_v20 = vld [vmem:[%s4527_s6 + $0x28] sm:$0xff] }
  0xbd   : > { %v621_v23 = vsub.f32 %v619_v22, %v620_v21  ;;  %v3711_v22 = vpack.c.bf16 %v3196_v20, %v3195_v19 }
  0xbf   : > { %v623_v24 = vadd.f32 1e-12, %v621_v23 }
  0xc1   : > { %3819 = vrsqrt.f32 %v623_v24  ;;  %v3197_v24 = vld [vmem:[%s4527_s6 + $0x30] sm:$0xff] }
  0xcb   : > { %v3820_v26 = vpop.eup %3819 }
  0xcc   : > { %v625_v28 = vmul.f32 %v3820_v26, %v622_v25  ;;  %v3198_v25 = vld [vmem:[%s4527_s6 + $0x38] sm:$0xff] }
  0xcd   : > { %v3714_v26 = vpack.c.bf16 %v3198_v25, %v3197_v24  ;;  %v3218_v25 = vld [vmem:[%s4555_s30] ss:$0 sm:$0xff] }
  0xce   : > { %v632_v32 = vmul.f32 %v3177_v27, %v625_v28 }
  0xd0   : > { %v4052_v34 = vadd.f32 %v3178_v31, %v632_v32  ;;  %v3193_v31 = vld [vmem:[%s4526_s5 + $0x1] ss:$0 sm:$0xff] }
  0xd2   : > { %3435 = vmatmul.mubr.msk.f32.vlgmr.msra.gmra.mrb[0].mxu0 %vm609_vm0, %v4052_v34  ;;  %3446 = vmatmul.mubr.msk.f32.vlgmr.msra.gmra.mrb[0].mxu1 %vm609_vm0, %v4052_v34 }
  0xd3   : > { %3700 = vmatpush3.bf16.msra.mxu0 %v3699_v33  ;;  %3456 = vmatprep.mubr.msk.f32.mxu0 %vm3873_vm1, %v3874_v17 }
  0xd4   : > { %3701 = vmatprep.subr.bf16.mxu0 %v3872_v9  ;;  %3466 = vmatprep.mubr.msk.f32.mxu1 %vm3873_vm1, %v3874_v17 }
  0xd7   : > { %3703 = vmatpush3.bf16.msra.mxu0 %v3702_v37 }
  0xd8   : > { %3459 = vmatprep.subr.mxu0 %v3874_v17 }
  0xda   : > { %3457 = vmatmul.mubr.msk.f32.vlgmr.msra.gmra.mrb[2].mxu0 %vm609_vm0, %v4052_v34 }
  0xdb   : > { %3461 = vmatprep.mubr.msk.f32.mxu0 %vm3873_vm1, %v3874_v17 }
 0x1a5   : > { %v725_v39 = vpop.f32.mrb[0].mxu0  ;;  %v806_v40 = vpop.f32.mrb[0].mxu1 }
 0x1a6   : > { %v807_v44 = vadd.f32 %v3181_v38, %v806_v40  ;;  %v3436_v45 = vpop.f32.mrb[1].mxu0  ;;  %v3447_v46 = vpop.f32.mrb[1].mxu1  ;;  %v726_v48 = vadd.f32 %v3179_v43, %v725_v39 }
 0x1a8   : > { %3460 = vmatpush3.xpose.msk.msra.mxu0 %vm891_vm2, %v807_v44 }
 0x1a9   : > { %3704 = vmatprep.subr.bf16.mxu0 %v3872_v9 }
 0x1ab   : > { %3462 = vmatmul.mubr.msk.f32.vlgmr.msra.gmra.mrb[4].mxu0 %vm891_vm2, %v726_v48  ;;  %v3213_v48 = vld [vmem:[%s4531_s10 + $0x18] sm:$0xff] }
 0x1ac   : > { %3706 = vmatpush3.bf16.msra.mxu0 %v3705_v47  ;;  %3477 = vmatprep.mubr.msk.f32.mxu0 %vm3873_vm1, %v3874_v17  ;;  %v3212_v47 = vld [vmem:[%s4531_s10 + $0x10] sm:$0xff] }
 0x1ad   : > { %v887_v53 = vpop.f32.mrb[2].mxu0  ;;  %3707 = vmatprep.subr.bf16.mxu0 %v3872_v9  ;;  %v3723_v49 = vpack.c.bf16 %v3213_v48, %v3212_v47 }
 0x1ae   : > { %v888_v56 = vadd.f32 %v3183_v51, %v887_v53  ;;  %v3458_v57 = vpop.f32.mrb[3].mxu0  ;;  %v1053_v51 = vld [vmem:[%s4531_s10] sm:$0xff] }
 0x1b0   : > { %3465 = vmatpush3.msra.mxu1 %v888_v56  ;;  %3709 = vmatpush3.bf16.msra.mxu0 %v3708_v52  ;;  %v1054_v52 = vld [vmem:[%s4531_s10 + $0x8] sm:$0xff] }
 0x1b1   : > { %3716 = vmatprep.subr.bf16.mxu0 %v3872_v9  ;;  %3710 = vmatprep.subr.bf16.mxu1 %v3872_v9  ;;  %v3726_v54 = vpack.c.bf16 %v1054_v52, %v1053_v51 }
 0x1b3   : > { %3478 = vmatmul.mubr.msk.f32.vlgmr.msra.gmra.mrb[6].mxu0 %vm609_vm0, %v4052_v34 }
 0x1b4   : > { %3718 = vmatpush3.bf16.msra.mxu0 %v3717_v58  ;;  %3499 = vmatprep.mubr.msk.f32.mxu0 %vm3873_vm1, %v3874_v17 }
 0x1b5   : > { %3719 = vmatprep.subr.bf16.mxu0 %v3872_v9 }
 0x1b8   : > { %3721 = vmatpush3.bf16.msra.mxu0 %v3720_v61  ;;  %v3216_v61 = vld [vmem:[%s4532_s11] ss:$0 sm:$0xff] }
 0x1b9   : > { %3722 = vmatprep.subr.bf16.mxu0 %v3872_v9 }
 0x1bb   : > { %3500 = vmatmul.mubr.msk.f32.vlgmr.msra.gmra.mrb[8].mxu0 %vm609_vm0, %v4052_v34 }
 0x1bc   : > { %3516 = vmatprep.mubr.msk.f32.mxu0 %vm3873_vm1, %v3874_v17  ;;  %3724 = vmatpush3.bf16.msra.mxu0 %v3723_v49 }
 0x1bd   : > { %3728 = vmatprep.subr.bf16.mxu0 %v3872_v9 }
 0x27e   : > { %v964_v3 = vpop.f32.mrb[4].mxu0 }
 0x27f   : > { %v965_v4 = vadd.f32 %v964_v3, %v4130_v2  ;;  %v3463_v5 = vpop.f32.mrb[5].mxu0 }
 0x281   : > { %v969_v6 = vsel %vm968_vm4, %v965_v4, -inf }
 0x282   : > { %970 = vmax.xlane.f32.xlu1 %v969_v6 }
 0x286   : > { %v1134_v7 = vpop.f32.mrb[6].mxu0 }
 0x287   : > { %v3479_v8 = vpop.f32.mrb[7].mxu0  ;;  %v1135_v36 = vadd.f32 %v3193_v31, %v1134_v7  ;;  %v1653_v7 = vld [vmem:[%s4535_s14] sm:$0xff]  ;;  %v1748_v31 = vld [vmem:[%s4537_s16 + $0x10] sm:$0xff] }
 0x288   : > { %v1654_v8 = vld [vmem:[%s4535_s14 + $0x8] sm:$0xff] }
 0x28e   : > { %v1300_v10 = vpop.f32.mrb[8].mxu0 }
 0x28f   : > { %v3501_v11 = vpop.f32.mrb[9].mxu0  ;;  %v1301_v37 = vadd.f32 %v3207_v35, %v1300_v10  ;;  %v3729_v10 = vpack.c.bf16 %v1654_v8, %v1653_v7  ;;  %v1750_v35 = vld [vmem:[%s4537_s16 + $0x20] sm:$0xff]  ;;  %v3228_v7 = vld [vmem:[%s4552_s21 + $0x58] sm:$0xff] }
 0x290   : > { %v1656_v11 = vld [vmem:[%s4535_s14 + $0x18] sm:$0xff] }
 0x30f   : > { %v971_v12 = vpop.xlane.xlu1 %970 }
 0x310   : > { %v972_v13 = vsub.f32 %v965_v4, %v971_v12 }
 0x312   : > { %v973_v14 = vmul.f32 1.442695, %v972_v13 }
 0x314   : > { %3821 = vpow2.f32 %v973_v14 }
 0x31e   : > { %v3822_v15 = vpop.eup %3821 }
 0x31f   : > { %v975_v16 = vsel %vm968_vm4, %v3822_v15, 0.0 }
 0x320   : > { %976 = vadd.xlane.f32.xlu1 %v975_v16 }
 0x3ad   : > { %v977_v18 = vpop.xlane.xlu1 %976 }
 0x3ae   : > { %3823 = vrcp.f32 %v977_v18 }
 0x3b8   : > { %v3824_v21 = vpop.eup %3823 }
 0x3b9   : > { %v979_v23 = vmul.f32 %v3824_v21, %v3822_v15 }
 0x3bb   : > { %3467 = vmatmul.mubr.msk.f32.vlgmr.msra.gmra.mrb[2].mxu1 %vm968_vm4, %v979_v23  ;;  %v3217_v23 = vld [vmem:[%s4533_s12] ss:$0 sm:$0xff] }
 0x3bc   : > { %3712 = vmatpush3.bf16.msra.mxu1 %v3711_v22  ;;  %3488 = vmatprep.mubr.msk.f32.mxu1 %vm3873_vm1, %v3874_v17 }
 0x3bd   : > { %3713 = vmatprep.subr.bf16.mxu1 %v3872_v9 }
 0x3c0   : > { %3715 = vmatpush3.bf16.msra.mxu1 %v3714_v26 }
 0x3c1   : > { %3502 = vmatprep.subr.mxu1 %v3874_v17 }
 0x3c3   : > { %3489 = vmatmul.mubr.msk.f32.vlgmr.msra.gmra.mrb[4].mxu1 %vm609_vm0, %v4052_v34 }
 0x3c4   : > { %3504 = vmatprep.mubr.msk.f32.mxu1 %vm3873_vm1, %v3874_v17 }
 0x48e   : > { %v1049_v27 = vpop.f32.mrb[2].mxu1 }
 0x48f   : > { %v3468_v28 = vpop.f32.mrb[3].mxu1 }
 0x490   : > { %v1746_v28 = vld [vmem:[%s4537_s16] sm:$0xff] }
 0x496   : > { %v1217_v30 = vpop.f32.mrb[4].mxu1 }
 0x497   : > { %v1218_v32 = vadd.f32 %v3200_v29, %v1217_v30  ;;  %v3490_v33 = vpop.f32.mrb[5].mxu1  ;;  %v1747_v29 = vld [vmem:[%s4537_s16 + $0x8] sm:$0xff] }
 0x498   : > { %v3735_v30 = vpack.c.bf16 %v1747_v29, %v1746_v28 }
 0x499   : > { %3503 = vmatpush3.xpose.msk.msra.mxu1 %vm891_vm2, %v1218_v32  ;;  %v1749_v32 = vld [vmem:[%s4537_s16 + $0x18] sm:$0xff] }
 0x49a   : > { %3507 = vmatprep.subr.mxu1 %v3874_v17  ;;  %v3738_v33 = vpack.c.bf16 %v1749_v32, %v1748_v31  ;;  %v3235_v31 = vld [vmem:[%s4527_s6 + $0x58] sm:$0xff] }
 0x49c   : > { %3505 = vmatmul.mubr.msk.f32.vlgmr.msra.gmra.mrb[6].mxu1 %vm891_vm2, %v1135_v36  ;;  %v1751_v36 = vld [vmem:[%s4537_s16 + $0x28] sm:$0xff] }
 0x49d   : > { %3508 = vmatpush3.msra.mxu1 %v1301_v37  ;;  %3509 = vmatprep.mubr.msk.f32.mxu1 %vm3873_vm1, %v3874_v17  ;;  %v3741_v37 = vpack.c.bf16 %v1751_v36, %v1750_v35 }
 0x49e   : > { %3725 = vmatprep.subr.bf16.mxu1 %v3872_v9 }
 0x56f   : > { %v1376_v38 = vpop.f32.mrb[6].mxu1 }
 0x570   : > { %v1377_v39 = vadd.f32 %v1376_v38, %v4130_v2  ;;  %v3506_v40 = vpop.f32.mrb[7].mxu1  ;;  %v1752_v38 = vld [vmem:[%s4537_s16 + $0x30] sm:$0xff] }
 0x572   : > { %v1380_v41 = vsel %vm968_vm4, %v1377_v39, -inf }
 0x573   : > { %1381 = vmax.xlane.f32.xlu0 %v1380_v41  ;;  %v3219_v41 = vld [vmem:[%s4536_s15] ss:$0 sm:$0xff] }
 0x600   : > { %v1382_v42 = vpop.xlane.xlu0 %1381 }
 0x601   : > { %v1383_v43 = vsub.f32 %v1377_v39, %v1382_v42  ;;  %v1753_v39 = vld [vmem:[%s4537_s16 + $0x38] sm:$0xff] }
 0x602   : > { %v3744_v40 = vpack.c.bf16 %v1753_v39, %v1752_v38 }
 0x603   : > { %v1384_v44 = vmul.f32 1.442695, %v1383_v43 }
 0x605   : > { %3825 = vpow2.f32 %v1384_v44 }
 0x60f   : > { %v3826_v45 = vpop.eup %3825 }
 0x610   : > { %v1386_v46 = vsel %vm968_vm4, %v3826_v45, 0.0 }
 0x611   : > { %1387 = vadd.xlane.f32.xlu1 %v1386_v46 }
 0x69e   : > { %v1388_v50 = vpop.xlane.xlu1 %1387 }
 0x69f   : > { %3827 = vrcp.f32 %v1388_v50 }
 0x6a9   : > { %v3828_v53 = vpop.eup %3827 }
 0x6aa   : > { %v1390_v55 = vmul.f32 %v3828_v53, %v3826_v45 }
 0x6ac   : > { %3510 = vmatmul.mubr.msk.f32.vlgmr.msra.gmra.mrb[8].mxu1 %vm968_vm4, %v1390_v55 }
 0x6ad   : > { %3727 = vmatpush3.bf16.msra.mxu1 %v3726_v54  ;;  %3523 = vmatprep.mubr.msk.f32.mxu1 %vm3873_vm1, %v3874_v17  ;;  %v3221_v54 = vld [vmem:[%s4538_s17] ss:$0 sm:$0xff] }
 0x6ae   : > { %3734 = vmatprep.subr.bf16.mxu1 %v3872_v9 }
 0x6b0   : > { %3524 = vmatmul.mubr.msk.f32.vlgmr.msra.gmra.mrb[10].mxu1 %vm891_vm2, %v1049_v27 }
 0x6b1   : > { %3553 = vmatprep.mubr.msk.f32.mxu1 %vm3873_vm1, %v3874_v17  ;;  %3736 = vmatpush3.bf16.msra.mxu1 %v3735_v30  ;;  %v3234_v30 = vld [vmem:[%s4527_s6 + $0x50] sm:$0xff] }
 0x6b2   : > { %3737 = vmatprep.subr.bf16.mxu1 %v3872_v9  ;;  %v3756_v32 = vpack.c.bf16 %v3235_v31, %v3234_v30 }
 0x6b5   : > { %3739 = vmatpush3.bf16.msra.mxu1 %v3738_v33  ;;  %v3244_v33 = vld [vmem:[%s4530_s9 + $0x2] ss:$0 sm:$0xff] }
 0x6b6   : > { %3740 = vmatprep.subr.bf16.mxu1 %v3872_v9 }
 0x6b9   : > { %3742 = vmatpush3.bf16.msra.mxu1 %v3741_v37 }
 0x6ba   : > { %3743 = vmatprep.subr.bf16.mxu1 %v3872_v9 }
 0x6bd   : > { %3745 = vmatpush3.bf16.msra.mxu1 %v3744_v40  ;;  %v3237_v40 = vld [vmem:[%s4528_s7 + $0x2] ss:$0 sm:$0xff] }
 0x6be   : > { %3758 = vmatprep.subr.bf16.mxu1 %v3872_v9 }
 0x77f   : > { %v1460_v56 = vpop.f32.mrb[8].mxu1 }
 0x780   : > { %v3511_v57 = vpop.f32.mrb[9].mxu1  ;;  %3517 = vmatmul.mubr.msk.f32.vlgmr.msra.gmra.mrb[10].mxu0 %vm891_vm2, %v1460_v56 }
 0x781   : > { %3534 = vmatprep.mubr.msk.f32.mxu0 %vm3873_vm1, %v3874_v17  ;;  %3730 = vmatpush3.bf16.msra.mxu0 %v3729_v10  ;;  %v3241_v10 = vld [vmem:[%s4529_s8 + $0x50] sm:$0xff] }
 0x782   : > { %3731 = vmatprep.subr.bf16.mxu0 %v3872_v9 }
 0x783   : > { %v1609_v58 = vpop.f32.mrb[10].mxu1 }
 0x784   : > { %v3525_v59 = vpop.f32.mrb[11].mxu1 }
 0x853   : > { %v1536_v60 = vpop.f32.mrb[10].mxu0 }
 0x854   : > { %v1610_v63 = vadd.f32 %v1609_v58, %v1536_v60  ;;  %v3518_v0 = vpop.f32.mrb[11].mxu0 }
 0x855   : > { %v3226_v0 = vld [vmem:[%s4552_s21 + $0x48] sm:$0xff] }
 0x856   : > { %v1620_v1 = vadd.f32 %v3216_v61, %v1610_v63  ;;  %v3225_v63 = vld [vmem:[%s4552_s21 + $0x40] sm:$0xff] }
 0x858   : > { %v1621_v3 = vadd.f32 %v1620_v1, %v4052_v34  ;;  %v1655_v34 = vld [vmem:[%s4535_s14 + $0x10] sm:$0xff]  ;;  %v3747_v1 = vpack.c.bf16 %v3226_v0, %v3225_v63 }
 0x859   : > { %v3732_v12 = vpack.c.bf16 %v1656_v11, %v1655_v34  ;;  %v3242_v34 = vld [vmem:[%s4529_s8 + $0x58] sm:$0xff] }
 0x85a   : > { %v1624_v4 = vsel %vm609_vm0, %v1621_v3, 0.0  ;;  %v1628_v5 = vmul.f32 %v1621_v3, %v1621_v3  ;;  %v3762_v11 = vpack.c.bf16 %v3242_v34, %v3241_v10  ;;  %v3258_v34 = vld [vmem:[%s4527_s6 + $0x60] sm:$0xff] }
 0x85b   : > { %1625 = vadd.xlane.f32.xlu0 %v1624_v4  ;;  %3733 = vmatpush3.bf16.msra.mxu0 %v3732_v12  ;;  %v3240_v4 = vld [vmem:[%s4529_s8 + $0x48] sm:$0xff] }
 0x85c   : > { %v1629_v6 = vsel %vm609_vm0, %v1628_v5, 0.0  ;;  %3746 = vmatprep.subr.bf16.mxu0 %v3872_v9 }
 0x85d   : > { %1630 = vadd.xlane.f32.xlu1 %v1629_v6  ;;  %v3227_v6 = vld [vmem:[%s4552_s21 + $0x50] sm:$0xff] }
 0x85e   : > { %v3750_v8 = vpack.c.bf16 %v3228_v7, %v3227_v6 }
 0x8e8   : > { %v1626_v13 = vpop.xlane.xlu0 %1625 }
 0x8e9   : > { %v1627_v14 = vmul.f32 0.03125, %v1626_v13 }
 0x8ea   : > { %v1631_v15 = vpop.xlane.xlu1 %1630 }
 0x8eb   : > { %v1633_v16 = vmul.f32 %v1627_v14, %v1627_v14  ;;  %v1632_v18 = vmul.f32 0.03125, %v1631_v15  ;;  %v1635_v21 = vsub.f32 %v1621_v3, %v1627_v14  ;;  %v3239_v3 = vld [vmem:[%s4529_s8 + $0x40] sm:$0xff] }
 0x8ec   : > { %v3759_v5 = vpack.c.bf16 %v3240_v4, %v3239_v3 }
 0x8ed   : > { %v1634_v19 = vsub.f32 %v1632_v18, %v1633_v16 }
 0x8ef   : > { %v1636_v20 = vadd.f32 1e-12, %v1634_v19 }
 0x8f1   : > { %3829 = vrsqrt.f32 %v1636_v20 }
 0x8fb   : > { %v3830_v22 = vpop.eup %3829 }
 0x8fc   : > { %v1638_v24 = vmul.f32 %v3830_v22, %v1635_v21  ;;  %v3223_v22 = vld [vmem:[%s4539_s18] ss:$0 sm:$0xff] }
 0x8fe   : > { %v1645_v26 = vmul.f32 %v3217_v23, %v1638_v24  ;;  %v3232_v24 = vld [vmem:[%s4527_s6 + $0x40] sm:$0xff] }
 0x900   : > { %v1652_v27 = vadd.f32 %v3218_v25, %v1645_v26  ;;  %v3233_v25 = vld [vmem:[%s4527_s6 + $0x48] sm:$0xff]  ;;  %v3224_v26 = vld [vmem:[%s4540_s19] ss:$0 sm:$0xff] }
 0x901   : > { %v3753_v28 = vpack.c.bf16 %v3233_v25, %v3232_v24 }
 0x902   : > { %3535 = vmatmul.mubr.msk.f32.vlgmr.msra.gmra.mrb[12].mxu0 %vm609_vm0, %v1652_v27 }
 0x903   : > { %3564 = vmatprep.mubr.msk.f32.mxu0 %vm3873_vm1, %v3874_v17  ;;  %3748 = vmatpush3.bf16.msra.mxu0 %v3747_v1 }
 0x904   : > { %3749 = vmatprep.subr.bf16.mxu0 %v3872_v9 }
 0x907   : > { %3751 = vmatpush3.bf16.msra.mxu0 %v3750_v8 }
 0x908   : > { %3752 = vmatprep.subr.bf16.mxu0 %v3872_v9 }
 0x9d5   : > { %v1733_v42 = vpop.f32.mrb[12].mxu0 }
 0x9d6   : > { %v1734_v43 = vadd.f32 %v3219_v41, %v1733_v42  ;;  %v3536_v44 = vpop.f32.mrb[13].mxu0  ;;  %v3251_v42 = vld [vmem:[%s4552_s21 + $0x60] sm:$0xff] }
 0x9d7   : > { %v3230_v44 = vld [vmem:[%s4526_s5 + $0x2] ss:$0 sm:$0xff] }
 0x9d8   : > { %v1737_v45 = vmul.f32 %v1734_v43, %v1734_v43 }
 0x9da   : > { %v1738_v46 = vmul.f32 %v1737_v45, %v1734_v43 }
 0x9dc   : > { %v1739_v47 = vmul.f32 0.044715, %v1738_v46 }
 0x9de   : > { %v1740_v48 = vadd.f32 %v1739_v47, %v1734_v43 }
 0x9e0   : > { %v1741_v49 = vmul.f32 0.7978846, %v1740_v48 }
 0x9e2   : > { %3831 = vtanh.f32 %v1741_v49  ;;  %v3253_v49 = vld [vmem:[%s4552_s21 + $0x70] sm:$0xff] }
 0x9ec   : > { %v3832_v50 = vpop.eup %3831 }
 0x9ed   : > { %v1743_v51 = vadd.f32 1.0, %v3832_v50  ;;  %v3254_v50 = vld [vmem:[%s4552_s21 + $0x78] sm:$0xff] }
 0x9ef   : > { %v1744_v52 = vmul.f32 0.5, %v1743_v51  ;;  %v3768_v51 = vpack.c.bf16 %v3254_v50, %v3253_v49 }
 0x9f1   : > { %v1745_v53 = vmul.f32 %v1744_v52, %v1734_v43  ;;  %v3252_v43 = vld [vmem:[%s4552_s21 + $0x68] sm:$0xff]  ;;  %v3265_v52 = vld [vmem:[%s4529_s8 + $0x60] sm:$0xff] }
 0x9f2   : > { %v3765_v47 = vpack.c.bf16 %v3252_v43, %v3251_v42  ;;  %v3249_v43 = vld [vmem:[%s4531_s10 + $0x20] sm:$0xff] }
 0x9f3   : > { %3554 = vmatmul.mubr.msk.f32.vlgmr.msra.gmra.mrb[12].mxu1 %vm1761_vm5, %v1745_v53  ;;  %v3266_v53 = vld [vmem:[%s4529_s8 + $0x68] sm:$0xff] }
 0x9f4   : > { %3586 = vmatprep.mubr.msk.f32.mxu1 %vm3873_vm1, %v3874_v17  ;;  %3760 = vmatpush3.bf16.msra.mxu1 %v3759_v5 }
 0x9f5   : > { %3761 = vmatprep.subr.bf16.mxu1 %v3872_v9 }
 0x9f8   : > { %3763 = vmatpush3.bf16.msra.mxu1 %v3762_v11  ;;  %v3259_v11 = vld [vmem:[%s4527_s6 + $0x68] sm:$0xff] }
 0x9f9   : > { %3594 = vmatprep.subr.mxu1 %v3874_v17 }
 0xac6   : > { %v1831_v55 = vpop.f32.mrb[12].mxu1 }
 0xac7   : > { %v1832_v56 = vadd.f32 %v3221_v54, %v1831_v55  ;;  %v3555_v57 = vpop.f32.mrb[13].mxu1  ;;  %v3777_v54 = vpack.c.bf16 %v3266_v53, %v3265_v52  ;;  %v3267_v55 = vld [vmem:[%s4529_s8 + $0x70] sm:$0xff]  ;;  %v3280_v53 = vld [vmem:[%s4532_s11 + $0x1] ss:$0 sm:$0xff] }
 0xac9   : > { %v1835_v58 = vadd.f32 %v1832_v56, %v1652_v27  ;;  %v3268_v56 = vld [vmem:[%s4529_s8 + $0x78] sm:$0xff] }
 0xaca   : > { %v3780_v57 = vpack.c.bf16 %v3268_v56, %v3267_v55 }
 0xacb   : > { %v1838_v59 = vsel %vm609_vm0, %v1835_v58, 0.0  ;;  %v1842_v60 = vmul.f32 %v1835_v58, %v1835_v58 }
 0xacc   : > { %1839 = vadd.xlane.f32.xlu0 %v1838_v59 }
 0xacd   : > { %v1843_v61 = vsel %vm609_vm0, %v1842_v60, 0.0 }
 0xace   : > { %1844 = vadd.xlane.f32.xlu1 %v1843_v61 }
 0xb59   : > { %v1840_v12 = vpop.xlane.xlu0 %1839 }
 0xb5a   : > { %v1841_v13 = vmul.f32 0.03125, %v1840_v12 }
 0xb5b   : > { %v1845_v14 = vpop.xlane.xlu1 %1844 }
 0xb5c   : > { %v1847_v15 = vmul.f32 %v1841_v13, %v1841_v13  ;;  %v1846_v16 = vmul.f32 0.03125, %v1845_v14  ;;  %v1849_v20 = vsub.f32 %v1835_v58, %v1841_v13  ;;  %v3771_v13 = vpack.c.bf16 %v3259_v11, %v3258_v34 }
 0xb5e   : > { %v1848_v18 = vsub.f32 %v1846_v16, %v1847_v15  ;;  %v3260_v15 = vld [vmem:[%s4527_s6 + $0x70] sm:$0xff]  ;;  %v3261_v16 = vld [vmem:[%s4527_s6 + $0x78] sm:$0xff] }
 0xb60   : > { %v1850_v19 = vadd.f32 1e-12, %v1848_v18  ;;  %v3774_v18 = vpack.c.bf16 %v3261_v16, %v3260_v15 }
 0xb62   : > { %3833 = vrsqrt.f32 %v1850_v19 }
 0xb6c   : > { %v3834_v21 = vpop.eup %3833 }
 0xb6d   : > { %v1852_v23 = vmul.f32 %v3834_v21, %v1849_v20  ;;  %v3263_v21 = vld [vmem:[%s4528_s7 + $0x3] ss:$0 sm:$0xff] }
 0xb6f   : > { %v1859_v27 = vmul.f32 %v3223_v22, %v1852_v23  ;;  %v3256_v23 = vld [vmem:[%s4526_s5 + $0x3] ss:$0 sm:$0xff] }
 0xb71   : > { %v4305_v29 = vadd.f32 %v3224_v26, %v1859_v27  ;;  %v3270_v26 = vld [vmem:[%s4530_s9 + $0x3] ss:$0 sm:$0xff] }
 0xb73   : > { %3565 = vmatmul.mubr.msk.f32.vlgmr.msra.gmra.mrb[14].mxu0 %vm609_vm0, %v4305_v29  ;;  %3587 = vmatmul.mubr.msk.f32.vlgmr.msra.gmra.mrb[14].mxu1 %vm609_vm0, %v4305_v29 }
 0xb74   : > { %3754 = vmatpush3.bf16.msra.mxu0 %v3753_v28  ;;  %3575 = vmatprep.mubr.msk.f32.mxu0 %vm3873_vm1, %v3874_v17 }
 0xb75   : > { %3755 = vmatprep.subr.bf16.mxu0 %v3872_v9  ;;  %3596 = vmatprep.mubr.msk.f32.mxu1 %vm3873_vm1, %v3874_v17 }
 0xb78   : > { %3757 = vmatpush3.bf16.msra.mxu0 %v3756_v32 }
 0xb79   : > { %3589 = vmatprep.subr.mxu0 %v3874_v17 }
 0xb7b   : > { %3576 = vmatmul.mubr.msk.f32.vlgmr.msra.gmra.mrb[16].mxu0 %vm609_vm0, %v4305_v29 }
 0xb7c   : > { %3591 = vmatprep.mubr.msk.f32.mxu0 %vm3873_vm1, %v3874_v17 }
 0xc46   : > { %v1949_v35 = vpop.f32.mrb[14].mxu0  ;;  %v2115_v36 = vpop.f32.mrb[14].mxu1 }
 0xc47   : > { %v2116_v37 = vadd.f32 %v3244_v33, %v2115_v36  ;;  %v3566_v38 = vpop.f32.mrb[15].mxu0  ;;  %v3588_v39 = vpop.f32.mrb[15].mxu1  ;;  %v1950_v48 = vadd.f32 %v3230_v44, %v1949_v35  ;;  %v3250_v44 = vld [vmem:[%s4531_s10 + $0x28] sm:$0xff] }
 0xc49   : > { %3595 = vmatpush3.msra.mxu1 %v2116_v37 }
 0xc4a   : > { %3770 = vmatprep.subr.bf16.mxu1 %v3872_v9 }
 0xc4e   : > { %v2032_v41 = vpop.f32.mrb[16].mxu0 }
 0xc4f   : > { %v2033_v45 = vadd.f32 %v3237_v40, %v2032_v41  ;;  %v3577_v46 = vpop.f32.mrb[17].mxu0  ;;  %v3275_v40 = vld [vmem:[%s4531_s10 + $0x30] sm:$0xff] }
 0xc50   : > { %v3786_v46 = vpack.c.bf16 %v3250_v44, %v3249_v43  ;;  %v3301_v43 = vld [vmem:[%s4538_s17 + $0x1] ss:$0 sm:$0xff] }
 0xc51   : > { %3590 = vmatpush3.xpose.msk.msra.mxu0 %vm891_vm2, %v2033_v45 }
 0xc52   : > { %3764 = vmatprep.subr.bf16.mxu0 %v3872_v9 }
 0xc54   : > { %3592 = vmatmul.mubr.msk.f32.vlgmr.msra.gmra.mrb[18].mxu0 %vm891_vm2, %v1950_v48 }
 0xc55   : > { %3766 = vmatpush3.bf16.msra.mxu0 %v3765_v47  ;;  %3607 = vmatprep.mubr.msk.f32.mxu0 %vm3873_vm1, %v3874_v17 }
 0xc56   : > { %3767 = vmatprep.subr.bf16.mxu0 %v3872_v9 }
 0xc59   : > { %3769 = vmatpush3.bf16.msra.mxu0 %v3768_v51 }
 0xc5a   : > { %3776 = vmatprep.subr.bf16.mxu0 %v3872_v9 }
 0xc5c   : > { %3608 = vmatmul.mubr.msk.f32.vlgmr.msra.gmra.mrb[20].mxu0 %vm609_vm0, %v4305_v29 }
 0xc5d   : > { %3778 = vmatpush3.bf16.msra.mxu0 %v3777_v54  ;;  %3629 = vmatprep.mubr.msk.f32.mxu0 %vm3873_vm1, %v3874_v17 }
 0xc5e   : > { %3779 = vmatprep.subr.bf16.mxu0 %v3872_v9 }
 0xc61   : > { %3781 = vmatpush3.bf16.msra.mxu0 %v3780_v57 }
 0xc62   : > { %3782 = vmatprep.subr.bf16.mxu0 %v3872_v9 }
 0xc64   : > { %3630 = vmatmul.mubr.msk.f32.vlgmr.msra.gmra.mrb[22].mxu0 %vm609_vm0, %v4305_v29 }
 0xc65   : > { %3646 = vmatprep.mubr.msk.f32.mxu0 %vm3873_vm1, %v3874_v17 }
 0xd27   : > { %v2191_v58 = vpop.f32.mrb[18].mxu0 }
 0xd28   : > { %v2192_v59 = vadd.f32 %v2191_v58, %v4130_v2  ;;  %v3593_v60 = vpop.f32.mrb[19].mxu0 }
 0xd2a   : > { %v2195_v61 = vsel %vm968_vm4, %v2192_v59, -inf }
 0xd2b   : > { %2196 = vmax.xlane.f32.xlu0 %v2195_v61  ;;  %v3286_v61 = vld [vmem:[%s4535_s14 + $0x28] sm:$0xff] }
 0xd2f   : > { %v2361_v63 = vpop.f32.mrb[20].mxu0 }
 0xd30   : > { %v3609_v0 = vpop.f32.mrb[21].mxu0  ;;  %v2362_v27 = vadd.f32 %v3256_v23, %v2361_v63 }
 0xd31   : > { %v3288_v0 = vld [vmem:[%s4535_s14 + $0x38] sm:$0xff] }
 0xd37   : > { %v2527_v1 = vpop.f32.mrb[22].mxu0 }
 0xd38   : > { %v3631_v3 = vpop.f32.mrb[23].mxu0  ;;  %v2528_v28 = vadd.f32 %v3270_v26, %v2527_v1 }
 0xdb8   : > { %v2197_v4 = vpop.xlane.xlu0 %2196 }
 0xdb9   : > { %v2198_v5 = vsub.f32 %v2192_v59, %v2197_v4 }
 0xdbb   : > { %v2199_v6 = vmul.f32 1.442695, %v2198_v5 }
 0xdbd   : > { %3835 = vpow2.f32 %v2199_v6 }
 0xdc7   : > { %v3836_v7 = vpop.eup %3835 }
 0xdc8   : > { %v2201_v8 = vsel %vm968_vm4, %v3836_v7, 0.0 }
 0xdc9   : > { %2202 = vadd.xlane.f32.xlu1 %v2201_v8 }
 0xe56   : > { %v2203_v10 = vpop.xlane.xlu1 %2202 }
 0xe57   : > { %3837 = vrcp.f32 %v2203_v10 }
 0xe61   : > { %v3838_v12 = vpop.eup %3837 }
 0xe62   : > { %v2205_v14 = vmul.f32 %v3838_v12, %v3836_v7  ;;  %v3283_v12 = vld [vmem:[%s4533_s12 + $0x1] ss:$0 sm:$0xff] }
 0xe64   : > { %3597 = vmatmul.mubr.msk.f32.vlgmr.msra.gmra.mrb[16].mxu1 %vm968_vm4, %v2205_v14  ;;  %v3284_v14 = vld [vmem:[%s4555_s30 + $0x1] ss:$0 sm:$0xff] }
 0xe65   : > { %3772 = vmatpush3.bf16.msra.mxu1 %v3771_v13  ;;  %3618 = vmatprep.mubr.msk.f32.mxu1 %vm3873_vm1, %v3874_v17 }
 0xe66   : > { %3773 = vmatprep.subr.bf16.mxu1 %v3872_v9 }
 0xe69   : > { %3775 = vmatpush3.bf16.msra.mxu1 %v3774_v18  ;;  %v3292_v18 = vld [vmem:[%s4537_s16 + $0x40] sm:$0xff] }
 0xe6a   : > { %3632 = vmatprep.subr.mxu1 %v3874_v17 }
 0xe6c   : > { %3619 = vmatmul.mubr.msk.f32.vlgmr.msra.gmra.mrb[18].mxu1 %vm609_vm0, %v4305_v29 }
 0xe6d   : > { %3634 = vmatprep.mubr.msk.f32.mxu1 %vm3873_vm1, %v3874_v17 }
 0xf37   : > { %v2275_v19 = vpop.f32.mrb[16].mxu1 }
 0xf38   : > { %v3598_v20 = vpop.f32.mrb[17].mxu1 }
 0xf3f   : > { %v2444_v22 = vpop.f32.mrb[18].mxu1 }
 0xf40   : > { %v2445_v24 = vadd.f32 %v3263_v21, %v2444_v22  ;;  %v3620_v25 = vpop.f32.mrb[19].mxu1  ;;  %v3294_v21 = vld [vmem:[%s4537_s16 + $0x50] sm:$0xff]  ;;  %v3295_v22 = vld [vmem:[%s4537_s16 + $0x58] sm:$0xff] }
 0xf41   : > { %v3798_v23 = vpack.c.bf16 %v3295_v22, %v3294_v21  ;;  %v3297_v25 = vld [vmem:[%s4537_s16 + $0x68] sm:$0xff] }
 0xf42   : > { %3633 = vmatpush3.xpose.msk.msra.mxu1 %vm891_vm2, %v2445_v24  ;;  %v3296_v24 = vld [vmem:[%s4537_s16 + $0x60] sm:$0xff] }
 0xf43   : > { %3637 = vmatprep.subr.mxu1 %v3874_v17  ;;  %v3801_v26 = vpack.c.bf16 %v3297_v25, %v3296_v24 }
 0xf45   : > { %3635 = vmatmul.mubr.msk.f32.vlgmr.msra.gmra.mrb[20].mxu1 %vm891_vm2, %v2362_v27  ;;  %v3298_v27 = vld [vmem:[%s4537_s16 + $0x70] sm:$0xff] }
 0xf46   : > { %3638 = vmatpush3.msra.mxu1 %v2528_v28  ;;  %3639 = vmatprep.mubr.msk.f32.mxu1 %vm3873_vm1, %v3874_v17  ;;  %v3299_v28 = vld [vmem:[%s4537_s16 + $0x78] sm:$0xff] }
 0xf47   : > { %3785 = vmatprep.subr.bf16.mxu1 %v3872_v9 }
0x1018   : > { %v2603_v30 = vpop.f32.mrb[20].mxu1 }
0x1019   : > { %v2604_v31 = vadd.f32 %v2603_v30, %v4130_v2  ;;  %v3636_v32 = vpop.f32.mrb[21].mxu1  ;;  %v3276_v2 = vld [vmem:[%s4531_s10 + $0x38] sm:$0xff]  ;;  %v3804_v30 = vpack.c.bf16 %v3299_v28, %v3298_v27 }
0x101a   : > { %v3783_v41 = vpack.c.bf16 %v3276_v2, %v3275_v40 }
0x101b   : > { %v2607_v33 = vsel %vm968_vm4, %v2604_v31, -inf }
0x101c   : > { %2608 = vmax.xlane.f32.xlu0 %v2607_v33  ;;  %3784 = vmatpush3.bf16.msra.mxu0 %v3783_v41 }
0x101d   : > { %3788 = vmatprep.subr.bf16.mxu0 %v3872_v9 }
0x10a9   : > { %v2609_v35 = vpop.xlane.xlu0 %2608 }
0x10aa   : > { %v2610_v36 = vsub.f32 %v2604_v31, %v2609_v35  ;;  %v3290_v31 = vld [vmem:[%s4536_s15 + $0x1] ss:$0 sm:$0xff] }
0x10ac   : > { %v2611_v37 = vmul.f32 1.442695, %v2610_v36 }
0x10ae   : > { %3839 = vpow2.f32 %v2611_v37 }
0x10b8   : > { %v3840_v38 = vpop.eup %3839 }
0x10b9   : > { %v2613_v39 = vsel %vm968_vm4, %v3840_v38, 0.0 }
0x10ba   : > { %2614 = vadd.xlane.f32.xlu1 %v2613_v39 }
0x1147   : > { %v2615_v42 = vpop.xlane.xlu1 %2614 }
0x1148   : > { %3841 = vrcp.f32 %v2615_v42 }
0x1152   : > { %v3842_v45 = vpop.eup %3841 }
0x1153   : > { %v2617_v47 = vmul.f32 %v3842_v45, %v3840_v38 }
0x1155   : > { %3640 = vmatmul.mubr.msk.f32.vlgmr.msra.gmra.mrb[22].mxu1 %vm968_vm4, %v2617_v47 }
0x1156   : > { %3787 = vmatpush3.bf16.msra.mxu1 %v3786_v46  ;;  %3653 = vmatprep.mubr.msk.f32.mxu1 %vm3873_vm1, %v3874_v17 }
0x1157   : > { %3794 = vmatprep.subr.bf16.mxu1 %v3872_v9 }
0x1159   : > { %3654 = vmatmul.mubr.msk.f32.vlgmr.msra.gmra.mrb[24].mxu1 %vm891_vm2, %v2275_v19  ;;  %v3293_v19 = vld [vmem:[%s4537_s16 + $0x48] sm:$0xff] }
0x115a   : > { %3683 = vmatprep.mubr.msk.f32.mxu1 %vm3873_vm1, %v3874_v17  ;;  %v3795_v20 = vpack.c.bf16 %v3293_v19, %v3292_v18 }
0x115c   : > { %3796 = vmatpush3.bf16.msra.mxu1 %v3795_v20 }
0x115d   : > { %3797 = vmatprep.subr.bf16.mxu1 %v3872_v9 }
0x1160   : > { %3799 = vmatpush3.bf16.msra.mxu1 %v3798_v23 }
0x1161   : > { %3800 = vmatprep.subr.bf16.mxu1 %v3872_v9 }
0x1164   : > { %3802 = vmatpush3.bf16.msra.mxu1 %v3801_v26 }
0x1165   : > { %3803 = vmatprep.subr.bf16.mxu1 %v3872_v9 }
0x1168   : > { %3805 = vmatpush3.bf16.msra.mxu1 %v3804_v30 }
0x1228   : > { %v2687_v48 = vpop.f32.mrb[22].mxu1 }
0x1229   : > { %v3641_v49 = vpop.f32.mrb[23].mxu1  ;;  %3647 = vmatmul.mubr.msk.f32.vlgmr.msra.gmra.mrb[24].mxu0 %vm891_vm2, %v2687_v48 }
0x122a   : > { %3664 = vmatprep.mubr.msk.f32.mxu0 %vm3873_vm1, %v3874_v17  ;;  %v3285_v17 = vld [vmem:[%s4535_s14 + $0x20] sm:$0xff] }
0x122b   : > { %v3789_v63 = vpack.c.bf16 %v3286_v61, %v3285_v17  ;;  %v3103_v61 = vshrl.u32 %v640_v62, 7 }
0x122c   : > { %v2836_v50 = vpop.f32.mrb[24].mxu1 }
0x122d   : > { %v3655_v51 = vpop.f32.mrb[25].mxu1  ;;  %3790 = vmatpush3.bf16.msra.mxu0 %v3789_v63  ;;  %v3306_v63 = vld [vmem:[%s4540_s19 + $0x1] ss:$0 sm:$0xff] }
0x122e   : > { %3791 = vmatprep.subr.bf16.mxu0 %v3872_v9 }
0x12fc   : > { %v2763_v52 = vpop.f32.mrb[24].mxu0 }
0x12fd   : > { %v2837_v54 = vadd.f32 %v2836_v50, %v2763_v52  ;;  %v3648_v55 = vpop.f32.mrb[25].mxu0 }
0x12ff   : > { %v2848_v56 = vadd.f32 %v3280_v53, %v2837_v54 }
0x1301   : > { %v2849_v57 = vadd.f32 %v2848_v56, %v4305_v29  ;;  %v3287_v29 = vld [vmem:[%s4535_s14 + $0x30] sm:$0xff] }
0x1302   : > { %v3792_v1 = vpack.c.bf16 %v3288_v0, %v3287_v29  ;;  %v3105_v29 = vstv %s3307_s27 }
0x1303   : > { %v2854_v58 = vsel %vm609_vm0, %v2849_v57, 0.0  ;;  %v2858_v59 = vmul.f32 %v2849_v57, %v2849_v57  ;;  %vm3106_vm6 = vcmp.lt.s32.totalorder %v3103_v61, %v3105_v29 }
0x1304   : > { %2855 = vadd.xlane.f32.xlu0 %v2854_v58  ;;  %3793 = vmatpush3.bf16.msra.mxu0 %v3792_v1 }
0x1305   : > { %v2859_v60 = vsel %vm609_vm0, %v2858_v59, 0.0 }
0x1306   : > { %2860 = vadd.xlane.f32.xlu1 %v2859_v60  ;;  %v3305_v60 = vld [vmem:[%s4539_s18 + $0x1] ss:$0 sm:$0xff] }
0x1391   : > { %v2856_v3 = vpop.xlane.xlu0 %2855 }
0x1392   : > { %v2857_v4 = vmul.f32 0.03125, %v2856_v3 }
0x1393   : > { %v2861_v5 = vpop.xlane.xlu1 %2860 }
0x1394   : > { %v2863_v6 = vmul.f32 %v2857_v4, %v2857_v4  ;;  %v2862_v7 = vmul.f32 0.03125, %v2861_v5  ;;  %v2865_v34 = vsub.f32 %v2849_v57, %v2857_v4 }
0x1396   : > { %v2864_v8 = vsub.f32 %v2862_v7, %v2863_v6 }
0x1398   : > { %v2866_v10 = vadd.f32 1e-12, %v2864_v8 }
0x139a   : > { %3843 = vrsqrt.f32 %v2866_v10 }
0x13a4   : > { %v3844_v11 = vpop.eup %3843 }
0x13a5   : > { %v2868_v13 = vmul.f32 %v3844_v11, %v2865_v34 }
0x13a7   : > { %v2875_v15 = vmul.f32 %v3283_v12, %v2868_v13 }
0x13a9   : > { %v2882_v16 = vadd.f32 %v3284_v14, %v2875_v15 }
0x13ab   : > { %3665 = vmatmul.mubr.msk.f32.vlgmr.msra.gmra.mrb[26].mxu0 %vm609_vm0, %v2882_v16 }
0x147e   : > { %v2965_v32 = vpop.f32.mrb[26].mxu0 }
0x147f   : > { %v2966_v33 = vadd.f32 %v3290_v31, %v2965_v32  ;;  %v3666_v35 = vpop.f32.mrb[27].mxu0 }
0x1481   : > { %v2969_v36 = vmul.f32 %v2966_v33, %v2966_v33 }
0x1483   : > { %v2970_v37 = vmul.f32 %v2969_v36, %v2966_v33 }
0x1485   : > { %v2971_v9 = vmul.f32 0.044715, %v2970_v37 }
0x1487   : > { %v2972_v38 = vadd.f32 %v2971_v9, %v2966_v33 }
0x1489   : > { %v2973_v39 = vmul.f32 0.7978846, %v2972_v38 }
0x148b   : > { %3845 = vtanh.f32 %v2973_v39 }
0x1495   : > { %v3846_v40 = vpop.eup %3845 }
0x1496   : > { %v2975_v2 = vadd.f32 1.0, %v3846_v40 }
0x1498   : > { %v2976_v41 = vmul.f32 0.5, %v2975_v2 }
0x149a   : > { %v2977_v42 = vmul.f32 %v2976_v41, %v2966_v33 }
0x149c   : > { %3684 = vmatmul.mubr.msk.f32.vlgmr.msra.gmra.mrb[26].mxu1 %vm1761_vm5, %v2977_v42 }
0x156f   : > { %v3064_v44 = vpop.f32.mrb[26].mxu1 }
0x1570   : > { %v3065_v45 = vadd.f32 %v3301_v43, %v3064_v44  ;;  %v3685_v46 = vpop.f32.mrb[27].mxu1 }
0x1572   : > { %v3068_v47 = vadd.f32 %v3065_v45, %v2882_v16 }
0x1574   : > { %v3073_v48 = vsel %vm609_vm0, %v3068_v47, 0.0  ;;  %v3077_v49 = vmul.f32 %v3068_v47, %v3068_v47 }
0x1575   : > { %3074 = vadd.xlane.f32.xlu0 %v3073_v48 }
0x1576   : > { %v3078_v50 = vsel %vm609_vm0, %v3077_v49, 0.0 }
0x1577   : > { %3079 = vadd.xlane.f32.xlu1 %v3078_v50 }
0x1602   : > { %v3075_v51 = vpop.xlane.xlu0 %3074 }
0x1603   : > { %v3076_v52 = vmul.f32 0.03125, %v3075_v51 }
0x1604   : > { %v3080_v53 = vpop.xlane.xlu1 %3079 }
0x1605   : > { %v3082_v54 = vmul.f32 %v3076_v52, %v3076_v52  ;;  %v3081_v55 = vmul.f32 0.03125, %v3080_v53  ;;  %v3084_v58 = vsub.f32 %v3068_v47, %v3076_v52 }
0x1607   : > { %v3083_v56 = vsub.f32 %v3081_v55, %v3082_v54 }
0x1609   : > { %v3085_v57 = vadd.f32 1e-12, %v3083_v56 }
0x160b   : > { %3847 = vrsqrt.f32 %v3085_v57 }
0x1615   : > { %v3848_v59 = vpop.eup %3847 }
0x1616   : > { %v3087_v17 = vmul.f32 %v3848_v59, %v3084_v58 }
0x1618   : > { %v3094_v0 = vmul.f32 %v3305_v60, %v3087_v17 }
0x161a   : > { %v3101_v1 = vadd.f32 %v3306_v63, %v3094_v0 }
0x161c   : > { %v3110_v3 = vrot.slane %v3101_v1, 1  ;;  %v3112_v4 = vrot.slane %v3101_v1, 2 }
0x161e   : > { %v3114_v5 = vsel %vm3106_vm6, %v3110_v3, %v3112_v4 }
0x161f   : > { %3116 = vst.msk [vmem:[%s604_s28] sm:$0x3f] %vm3115_vm7, %v3114_v5 }
0x1620 PF: > { %s36_s25 = sadd.s32 1, %s3869_s25  }
0x1621   : > { %p33_p9 = scmp.ge.s32.totalorder %s36_s25, 4  }
0x1623   :  { %35 = sbr.rel (!%p33_p9) target bundleno = 23 (0x17), region = 156 }

</bundles_post_ra>
